<compile_context>
chip_gen: v7x
topology: tpu7x:2x2x1
jax: 0.10.0
libtpu: 0.0.40
codegen_flags: <defaults>
</compile_context>

<pallas_src>
import jax
import jax.numpy as jnp
from jax.experimental import pallas as pl
from jax.experimental.pallas import tpu as pltpu

LANE = 128
SUBLANE = 8


def _round_up(x, m):
    return ((x + m - 1) // m) * m


def head_kernel(feat_ref, w1_ref, shift_ref, w2_ref, b2_ref, out_ref):
    # feat: [TB, D] f32 ; w1: [D, H] bf16 (BN scale pre-folded)
    # shift: [1, H] f32 ; w2: [H, Cp] bf16 ; b2: [1, Cp] f32 ; out: [TB, Cp] f32
    h = jnp.dot(
        feat_ref[...].astype(jnp.bfloat16),
        w1_ref[...],
        preferred_element_type=jnp.float32,
    )  # [TB, H] f32 accumulation on the MXU
    # BatchNorm1d (eval) shift (scale already folded into w1) + ReLU.
    h = jnp.maximum(h + shift_ref[...], 0.0)
    # Final classifier, bf16 operands, f32 accumulation.
    out_ref[...] = (
        jnp.dot(h.astype(jnp.bfloat16), w2_ref[...], preferred_element_type=jnp.float32)
        + b2_ref[...]
    )


def con_linear_head(feat, w1_bf16, bn_shift, w2_bf16, b2, *, num_class, block_b=256):
    """feat: [B, D] f32. Weights pre-folded / padded / bf16 (see prepare_kernel_params)."""
    B, D = feat.shape
    H = w1_bf16.shape[1]
    Cp = w2_bf16.shape[1]  # lane-padded classifier dim (multiple of 128)

    # Batch tile: full-MXU-height tiles for big batches, minimal padded tile otherwise.
    TB = block_b if B >= block_b else _round_up(B, SUBLANE)
    Bp = _round_up(B, TB)
    if Bp != B:
        feat = jnp.pad(feat, ((0, Bp - B), (0, 0)))

    out = pl.pallas_call(
        head_kernel,
        out_shape=jax.ShapeDtypeStruct((Bp, Cp), jnp.float32),
        grid=(Bp // TB,),
        in_specs=[
            pl.BlockSpec((TB, D), lambda i: (i, 0)),   # feat tile
            pl.BlockSpec((D, H), lambda i: (0, 0)),    # w1 (resident across grid)
            pl.BlockSpec((1, H), lambda i: (0, 0)),    # bn shift
            pl.BlockSpec((H, Cp), lambda i: (0, 0)),   # w2
            pl.BlockSpec((1, Cp), lambda i: (0, 0)),   # b2
        ],
        out_specs=pl.BlockSpec((TB, Cp), lambda i: (i, 0)),
        compiler_params=pltpu.CompilerParams(
            dimension_semantics=("parallel",),
        ),
    )(feat, w1_bf16, bn_shift, w2_bf16, b2)

    return out[:B, :num_class]


def make_params(key, feat_dim=384, hidden_dim=1024, num_class=219):
    """PyTorch-convention f32 parameters for the head (used by the reference)."""
    k1, k2, k3, k4, k5, k6 = jax.random.split(key, 6)
    # Linear(feat_dim -> hidden_dim, bias=False): PyTorch weight is [H, D].
    w1 = jax.random.normal(k1, (hidden_dim, feat_dim), jnp.float32) * 0.02
    # BatchNorm1d(hidden_dim) parameters, eval-mode semantics with running stats.
    gamma = 1.0 + 0.1 * jax.random.normal(k2, (hidden_dim,), jnp.float32)
    beta = 0.1 * jax.random.normal(k3, (hidden_dim,), jnp.float32)
    running_mean = 0.1 * jax.random.normal(k4, (hidden_dim,), jnp.float32)
    running_var = jnp.abs(1.0 + 0.1 * jax.random.normal(k5, (hidden_dim,), jnp.float32))
    eps = 1e-5
    bn_scale = gamma / jnp.sqrt(running_var + eps)
    bn_shift = beta - running_mean * bn_scale
    # fc: Linear(hidden_dim -> num_class) with bias. PyTorch weight is [C, H].
    w2 = jax.random.normal(k6, (num_class, hidden_dim), jnp.float32) * 0.02
    b2 = 0.01 * jax.random.normal(k1, (num_class,), jnp.float32)
    return dict(
        w1_t=w1.T,                                  # [D, H] f32
        bn_scale=bn_scale.reshape(1, hidden_dim),   # [1, H] f32
        bn_shift=bn_shift.reshape(1, hidden_dim),   # [1, H] f32
        w2_t=w2.T,                                  # [H, C] f32
        b2=b2.reshape(1, num_class),                # [1, C] f32
    )


def prepare_kernel_params(p):
    """Fold BN scale into w1, pad C to a lane multiple, cast weights to bf16."""
    H, C = p["w2_t"].shape
    Cp = _round_up(C, LANE)
    # Fold per-channel BN scale into the first matmul's weights (exact, f32), then bf16.
    w1_folded = (p["w1_t"] * p["bn_scale"]).astype(jnp.bfloat16)      # [D, H] bf16
    # Pad classifier dim 219 -> 256 with zeros for unmasked, lane-dense stores.
    w2_pad = jnp.pad(p["w2_t"], ((0, 0), (0, Cp - C))).astype(jnp.bfloat16)  # [H, Cp]
    b2_pad = jnp.pad(p["b2"], ((0, 0), (0, Cp - C))).astype(jnp.float32)     # [1, Cp]
    return dict(
        w1_bf16=w1_folded,
        bn_shift=p["bn_shift"].astype(jnp.float32),
        w2_bf16=w2_pad,
        b2=b2_pad,
        num_class=C,
    )


def reference(feat, p):
    # Pure-f32 reference matching PyTorch eval-mode semantics.
    h = feat @ p["w1_t"]
    h = h * p["bn_scale"] + p["bn_shift"]
    h = jnp.maximum(h, 0.0)
    return h @ p["w2_t"] + p["b2"]


if __name__ == "__main__":
    key = jax.random.PRNGKey(0)
    k_feat, k_param = jax.random.split(key)

    B, D, H, C = 8, 384, 1024, 219
    # Backbone output features (stand-in for ViT-small/16-384 pooled features).
    feat = jax.random.normal(k_feat, (B, D), jnp.float32)
    params = make_params(k_param, feat_dim=D, hidden_dim=H, num_class=C)
    kparams = prepare_kernel_params(params)

    out = con_linear_head(
        feat,
        kparams["w1_bf16"],
        kparams["bn_shift"],
        kparams["w2_bf16"],
        kparams["b2"],
        num_class=kparams["num_class"],
    )
    out = jax.block_until_ready(out)

    ref = reference(feat, params)
    assert out.shape == (B, C), out.shape
    # bf16 weights / activations (f32 accumulation): loose-ish tolerance vs. f32 reference.
    assert jnp.allclose(out, ref, atol=2e-2, rtol=2e-2), float(jnp.max(jnp.abs(out - ref)))
    print("KERNEL_OK")
</pallas_src>

<mosaic_0001>
module attributes {stable_mosaic.version = 11 : i64} {
  func.func @head_kernel(%arg0: i32, %arg1: memref<8x384xf32, #tpu.memory_space<vmem>>, %arg2: memref<384x1024xbf16, #tpu.memory_space<vmem>>, %arg3: memref<1x1024xf32, #tpu.memory_space<vmem>>, %arg4: memref<1024x256xbf16, #tpu.memory_space<vmem>>, %arg5: memref<1x256xf32, #tpu.memory_space<vmem>>, %arg6: memref<8x256xf32, #tpu.memory_space<vmem>>) attributes {dimension_semantics = [#tpu.dimension_semantics<parallel>], iteration_bounds = array<i64: 1>, scalar_prefetch = 0 : i64, scratch_operands = 0 : i64, tpu.core_type = #tpu.core_type<tc>, window_params = [{transform_indices = @transform_0, window_bounds = array<i64: 8, 384>}, {pipeline_mode = #tpu.pipeline_mode<synchronous>, transform_indices = @transform_1, window_bounds = array<i64: 384, 1024>}, {pipeline_mode = #tpu.pipeline_mode<synchronous>, transform_indices = @transform_2, window_bounds = array<i64: 1, 1024>}, {pipeline_mode = #tpu.pipeline_mode<synchronous>, transform_indices = @transform_3, window_bounds = array<i64: 1024, 256>}, {pipeline_mode = #tpu.pipeline_mode<synchronous>, transform_indices = @transform_4, window_bounds = array<i64: 1, 256>}, {transform_indices = @transform_5, window_bounds = array<i64: 8, 256>}]} {
    %c0 = arith.constant 0 : index
    %c0_0 = arith.constant 0 : index
    %0 = vector.load %arg1[%c0, %c0_0] : memref<8x384xf32, #tpu.memory_space<vmem>>, vector<8x384xf32>
    %1 = arith.truncf %0 : vector<8x384xf32> to vector<8x384xbf16>
    %c0_1 = arith.constant 0 : index
    %c0_2 = arith.constant 0 : index
    %2 = vector.load %arg2[%c0_1, %c0_2] : memref<384x1024xbf16, #tpu.memory_space<vmem>>, vector<384x1024xbf16>
    %cst = arith.constant dense<0.000000e+00> : vector<8x1024xf32>
    %3 = tpu.matmul %1, %2, %cst {dimension_numbers = #tpu.dot_dimension_numbers<[1], [0], [0], [1], [0, 0, 1, 1], [], []>} : vector<8x384xbf16>, vector<384x1024xbf16>, vector<8x1024xf32> -> vector<8x1024xf32>
    %c0_3 = arith.constant 0 : index
    %c0_4 = arith.constant 0 : index
    %4 = vector.load %arg3[%c0_3, %c0_4] : memref<1x1024xf32, #tpu.memory_space<vmem>>, vector<1x1024xf32>
    %5 = vector.broadcast %4 : vector<1x1024xf32> to vector<8x1024xf32>
    %6 = arith.addf %3, %5 : vector<8x1024xf32>
    %cst_5 = arith.constant 0.000000e+00 : f32
    %7 = vector.broadcast %cst_5 : f32 to vector<8x1024xf32>
    %8 = arith.maximumf %6, %7 : vector<8x1024xf32>
    %9 = arith.truncf %8 : vector<8x1024xf32> to vector<8x1024xbf16>
    %c0_6 = arith.constant 0 : index
    %c0_7 = arith.constant 0 : index
    %10 = vector.load %arg4[%c0_6, %c0_7] : memref<1024x256xbf16, #tpu.memory_space<vmem>>, vector<1024x256xbf16>
    %cst_8 = arith.constant dense<0.000000e+00> : vector<8x256xf32>
    %11 = tpu.matmul %9, %10, %cst_8 {dimension_numbers = #tpu.dot_dimension_numbers<[1], [0], [0], [1], [0, 0, 1, 1], [], []>} : vector<8x1024xbf16>, vector<1024x256xbf16>, vector<8x256xf32> -> vector<8x256xf32>
    %c0_9 = arith.constant 0 : index
    %c0_10 = arith.constant 0 : index
    %12 = vector.load %arg5[%c0_9, %c0_10] : memref<1x256xf32, #tpu.memory_space<vmem>>, vector<1x256xf32>
    %13 = vector.broadcast %12 : vector<1x256xf32> to vector<8x256xf32>
    %14 = arith.addf %11, %13 : vector<8x256xf32>
    %c0_11 = arith.constant 0 : index
    %c0_12 = arith.constant 0 : index
    %15 = vector.load %arg6[%c0_11, %c0_12] : memref<8x256xf32, #tpu.memory_space<vmem>>, vector<8x256xf32>
    tpu.vector_store %arg6[%c0_11, %c0_12], %14 {strides = array<i32>} : memref<8x256xf32, #tpu.memory_space<vmem>>, vector<8x256xf32>,
    return
  }
  func.func @transform_0(%arg0: i32) -> (i32, i32) {
    %c0_i32 = arith.constant 0 : i32
    %c0_i32_0 = arith.constant 0 : i32
    return %arg0, %c0_i32 : i32, i32
  }
  func.func @transform_1(%arg0: i32) -> (i32, i32) {
    %c0_i32 = arith.constant 0 : i32
    %c0_i32_0 = arith.constant 0 : i32
    %c0_i32_1 = arith.constant 0 : i32
    return %c0_i32, %c0_i32_0 : i32, i32
  }
  func.func @transform_2(%arg0: i32) -> (i32, i32) {
    %c0_i32 = arith.constant 0 : i32
    %c0_i32_0 = arith.constant 0 : i32
    %c0_i32_1 = arith.constant 0 : i32
    return %c0_i32, %c0_i32_0 : i32, i32
  }
  func.func @transform_3(%arg0: i32) -> (i32, i32) {
    %c0_i32 = arith.constant 0 : i32
    %c0_i32_0 = arith.constant 0 : i32
    %c0_i32_1 = arith.constant 0 : i32
    return %c0_i32, %c0_i32_0 : i32, i32
  }
  func.func @transform_4(%arg0: i32) -> (i32, i32) {
    %c0_i32 = arith.constant 0 : i32
    %c0_i32_0 = arith.constant 0 : i32
    %c0_i32_1 = arith.constant 0 : i32
    return %c0_i32, %c0_i32_0 : i32, i32
  }
  func.func @transform_5(%arg0: i32) -> (i32, i32) {
    %c0_i32 = arith.constant 0 : i32
    %c0_i32_0 = arith.constant 0 : i32
    return %arg0, %c0_i32 : i32, i32
  }
}

</mosaic_0001>

<bundles_post_ra>
// kernel: tpu_custom_call.1
= control target key start
LH: loop header
LB: loop body
LE: loop exit
PB: predicated region body
PF: predicated region fallthrough
CT: control target
= control target key end

     0   :  { %10 = vsyncpa [#allocation3], 0  ;;  %s3413_s0 = inlined_call_operand.hbm [shape: f32[8,384], index: 0, kind: input, shape index: {}]   ;;  %s3414_s1 = inlined_call_operand.hbm [shape: bf16[384,1024], index: 1, kind: input, shape index: {}]   ;;  %s3415_s2 = inlined_call_operand.hbm [shape: f32[1,1024], index: 2, kind: input, shape index: {}]   ;;  %s3416_s3 = inlined_call_operand.hbm [shape: bf16[1024,256], index: 3, kind: input, shape index: {}]   ;;  %s3417_s4 = inlined_call_operand.vmem [shape: f32[1,256], index: 4, kind: input, shape index: {}]   ;;  %s3418_s5 = inlined_call_operand.hbm [shape: f32[8,256], index: 5, kind: output, shape index: {}]  }
   0x1   :  { %11 = vsyncpa [#allocation6], 0 }
   0x2   :  { %12 = vsyncpa [#allocation9], 0 }
   0x3   :  { %13 = vsyncpa [#allocation4], 0  ;;  %s3254_s18 = smov [#allocation5]   ;;  %s3136_s22 = scalar_lea.hbm %s3414_s1, 24576 }
   0x4   :  { %s29_s19 = sshll.u32 %s3254_s18, 4  ;;  %p3137_p0 = scmp.ne.s32.totalorder %s3414_s1, %s3136_s22  ;;  %s30_s19 = int_to_ptr.vmem [resolvable:$true] %s29_s19 }
   0x5   :  { %p3140_p1 = scmp.lt.u32.totalorder %s3136_s22, %s3414_s1 }
   0x7   :  { %p3142_p2 = pnand %p3140_p1, %p3137_p0 }
   0x9   :  { %3145 = shalt.err (!%p3142_p2)
}
   0xa   :  { %s3146_s27 = scalar_lea.vmem %s30_s19, 24576  ;;  %p3151_p4 = scmp.lt.s32.totalorder %s30_s19, %s30_s19 }
   0xb   :  { %p3147_p3 = scmp.ne.s32.totalorder %s30_s19, %s3146_s27  ;;  %p3152_p5 = scmp.lt.s32.totalorder %s3146_s27, %s3146_s27 }
   0xd   :  { %p3153_p6 = por %p3152_p5, %p3151_p4 }
   0xf   :  { %p3154_p7 = pnand %p3153_p6, %p3147_p3 }
  0x11   :  { %3157 = shalt.err (!%p3154_p7)
}
  0x12   :  { %s3255_s28 = smov 512   ;;  %s3256_s29 = smov 32  }
  0x13   :  { %35 = dma.hbm_to_vmem [thread:$0]  %s3414_s1, 24576, %s30_s19, [#allocation6], %s3255_s28, %s3255_s28, %s3256_s29  }
  0x14   :  { %s3257_s7 = smov [#allocation2]   ;;  %s3258_s9 = smov [#allocation7]  }
  0x15   :  { %s20_s8 = sshll.u32 %s3257_s7, 4  ;;  %s42_s10 = sshll.u32 %s3258_s9, 4  ;;  %s21_s8 = int_to_ptr.vmem [resolvable:$true] %s20_s8  ;;  %s43_s10 = int_to_ptr.vmem [resolvable:$true] %s42_s10 }
  0x16   :  { %s3158_s13 = scalar_lea.hbm %s3413_s0, 384 }
  0x17   :  { %p3159_p8 = scmp.ne.s32.totalorder %s3413_s0, %s3158_s13  ;;  %p3162_p9 = scmp.lt.u32.totalorder %s3158_s13, %s3413_s0 }
  0x19   :  { %p3164_p10 = pnand %p3162_p9, %p3159_p8 }
  0x1b   :  { %3167 = shalt.err (!%p3164_p10)
}
  0x1c   :  { %s3168_s1 = scalar_lea.vmem %s21_s8, 384  ;;  %p3173_p12 = scmp.lt.s32.totalorder %s21_s8, %s21_s8 }
  0x1d   :  { %p3169_p11 = scmp.ne.s32.totalorder %s21_s8, %s3168_s1  ;;  %p3174_p13 = scmp.lt.s32.totalorder %s3168_s1, %s3168_s1 }
  0x1f   :  { %p3175_p0 = por %p3174_p13, %p3173_p12 }
  0x21   :  { %p3176_p1 = pnand %p3175_p0, %p3169_p11 }
  0x23   :  { %3179 = shalt.err (!%p3176_p1)
}
  0x24   :  { %23 = dma.hbm_to_vmem [thread:$0]  %s3413_s0, 384, %s21_s8, [#allocation3]  }
  0x25   :  { %s3180_s22 = scalar_lea.hbm %s3415_s2, 128 }
  0x26   :  { %p3181_p2 = scmp.ne.s32.totalorder %s3415_s2, %s3180_s22  ;;  %p3184_p3 = scmp.lt.u32.totalorder %s3180_s22, %s3415_s2 }
  0x28   :  { %p3186_p4 = pnand %p3184_p3, %p3181_p2 }
  0x2a   :  { %3189 = shalt.err (!%p3186_p4)
}
  0x2b   :  { %s3190_s27 = scalar_lea.vmem %s43_s10, 128  ;;  %p3195_p6 = scmp.lt.s32.totalorder %s43_s10, %s43_s10 }
  0x2c   :  { %p3191_p5 = scmp.ne.s32.totalorder %s43_s10, %s3190_s27  ;;  %p3196_p7 = scmp.lt.s32.totalorder %s3190_s27, %s3190_s27 }
  0x2e   :  { %p3197_p8 = por %p3196_p7, %p3195_p6 }
  0x30   :  { %p3198_p9 = pnand %p3197_p8, %p3191_p5 }
  0x32   :  { %3201 = shalt.err (!%p3198_p9)
}
  0x33   :  { %45 = dma.hbm_to_vmem [thread:$0]  %s3415_s2, 128, %s43_s10, [#allocation6]  }
  0x34   :  { %s3259_s29 = smov [#allocation8]   ;;  %s3202_s8 = scalar_lea.hbm %s3416_s3, 16384 }
  0x35   :  { %s51_s30 = sshll.u32 %s3259_s29, 4  ;;  %p3203_p10 = scmp.ne.s32.totalorder %s3416_s3, %s3202_s8  ;;  %s52_s30 = int_to_ptr.vmem [resolvable:$true] %s51_s30 }
  0x36   :  { %p3206_p11 = scmp.lt.u32.totalorder %s3202_s8, %s3416_s3 }
  0x38   :  { %p3208_p12 = pnand %p3206_p11, %p3203_p10 }
  0x3a   :  { %3211 = shalt.err (!%p3208_p12)
}
  0x3b   :  { %s3212_s14 = scalar_lea.vmem %s52_s30, 16384  ;;  %p3217_p0 = scmp.lt.s32.totalorder %s52_s30, %s52_s30 }
  0x3c   :  { %p3213_p13 = scmp.ne.s32.totalorder %s52_s30, %s3212_s14  ;;  %p3218_p1 = scmp.lt.s32.totalorder %s3212_s14, %s3212_s14 }
  0x3e   :  { %p3219_p2 = por %p3218_p1, %p3217_p0 }
  0x40   :  { %p3220_p3 = pnand %p3219_p2, %p3213_p13 }
  0x42   :  { %3223 = shalt.err (!%p3220_p3)
}
  0x43   :  { %s3260_s2 = smov 128   ;;  %s3261_s10 = smov 8  }
  0x44   :  { %57 = dma.hbm_to_vmem [thread:$0]  %s3416_s3, 16384, %s52_s30, [#allocation9], %s3260_s2, %s3260_s2, %s3261_s10  }
  0x45   :  { %3246 = dma.done.wait [#allocation3], 384  }
  0x46   :  { %3247 = vsyncadd [#allocation3], 4294966912 }
  0x47   :  { %3248 = dma.done.wait [#allocation6], 24704  }
  0x48   :  { %3249 = vsyncadd [#allocation6], 4294942592 }
  0x49   :  { %3250 = dma.done.wait [#allocation9], 16384  }
  0x4a   :  { %3251 = vsyncadd [#allocation9], 4294950912  ;;  %v3262_v0 = vmov 0   ;;  %v79_v1 = vld [vmem:[#allocation5] sm:$0xff]  ;;  %v74_v40 = vld [vmem:[#allocation2 + $0x8] sm:$0xff]  ;;  %s3263_s1 = smov [#allocation10]  }
  0x4b   :  { %1346 = vmatprep.mubr.bf16.mxu0 %v3262_v0  ;;  %v83_v2 = vld [vmem:[#allocation5 + $0x20] sm:$0xff]  ;;  %v3343_v42 = vpack.c.bf16 %v74_v40, %v74_v40  ;;  %s2569_s18 = sshll.u32 %s3263_s1, 4  ;;  %s2570_s18 = int_to_ptr.vmem [resolvable:$true] %s2569_s18 }
  0x4c   :  { %v87_v3 = vld [vmem:[#allocation5 + $0x40] sm:$0xff]  ;;  %v2581_v4 = vcombine.high %v79_v1, %v83_v2  ;;  %v2580_v5 = vcombine.low %v79_v1, %v83_v2  ;;  %s3224_s19 = scalar_lea.vmem %s2570_s18, 256  ;;  %p3229_p5 = scmp.lt.s32.totalorder %s2570_s18, %s2570_s18 }
  0x4d   :  { %v91_v6 = vld [vmem:[#allocation5 + $0x60] sm:$0xff]  ;;  %1305 = vmatprep.mubr.bf16.mxu1 %v3343_v42  ;;  %p3225_p4 = scmp.ne.s32.totalorder %s2570_s18, %s3224_s19  ;;  %p3230_p6 = scmp.lt.s32.totalorder %s3224_s19, %s3224_s19 }
  0x4e   :  { %v2589_v7 = vcombine.high %v87_v3, %v91_v6  ;;  %v95_v8 = vld [vmem:[#allocation5 + $0x80] sm:$0xff]  ;;  %1273 = vmatprep.subr.bf16.mxu1 %v2581_v4  ;;  %v2588_v10 = vcombine.low %v87_v3, %v91_v6 }
  0x4f   :  { %v99_v9 = vld [vmem:[#allocation5 + $0xa0] sm:$0xff]  ;;  %1274 = vmatpush1.bf16.msra.mxu1 %v2580_v5  ;;  %p3231_p7 = por %p3230_p6, %p3229_p5 }
  0x50   :  { %1275 = vmatprep.subr.bf16.mxu1 %v2589_v7  ;;  %v2597_v11 = vcombine.high %v95_v8, %v99_v9  ;;  %v103_v12 = vld [vmem:[#allocation5 + $0xc0] sm:$0xff]  ;;  %v2596_v20 = vcombine.low %v95_v8, %v99_v9 }
  0x51   :  { %v107_v13 = vld [vmem:[#allocation5 + $0xe0] sm:$0xff]  ;;  %p3232_p8 = pnand %p3231_p7, %p3225_p4 }
  0x52   :  { %v207_v14 = vld [vmem:[#allocation5 + $0x400] sm:$0xff]  ;;  %v2605_v23 = vcombine.high %v103_v12, %v107_v13  ;;  %v2604_v29 = vcombine.low %v103_v12, %v107_v13  ;;  %v75_v12 = vld [vmem:[#allocation2 + $0x10] sm:$0xff] }
  0x53   :  { %v211_v15 = vld [vmem:[#allocation5 + $0x420] sm:$0xff]  ;;  %1276 = vmatpush1.bf16.msra.mxu1 %v2588_v10 }
  0x54   :  { %v2709_v16 = vcombine.high %v207_v14, %v211_v15  ;;  %v2708_v17 = vcombine.low %v207_v14, %v211_v15  ;;  %v215_v18 = vld [vmem:[#allocation5 + $0x440] sm:$0xff]  ;;  %1277 = vmatprep.subr.bf16.mxu1 %v2597_v11 }
  0x55   :  { %v219_v19 = vld [vmem:[#allocation5 + $0x460] sm:$0xff] }
  0x56   :  { %v2717_v21 = vcombine.high %v215_v18, %v219_v19  ;;  %v223_v22 = vld [vmem:[#allocation5 + $0x480] sm:$0xff]  ;;  %1314 = vmatprep.subr.bf16.mxu0 %v2709_v16  ;;  %v2716_v27 = vcombine.low %v215_v18, %v219_v19  ;;  %v3346_v18 = vpack.c.bf16 %v75_v12, %v75_v12  ;;  %v124_v12 = vld [vmem:[#allocation5 + $0x168] sm:$0xff] }
  0x57   :  { %v227_v24 = vld [vmem:[#allocation5 + $0x4a0] sm:$0xff]  ;;  %1315 = vmatpush1.bf16.msra.mxu0 %v2708_v17  ;;  %1278 = vmatpush1.bf16.msra.mxu1 %v2596_v20 }
  0x58   :  { %v111_v25 = vld [vmem:[#allocation5 + $0x100] sm:$0xff]  ;;  %1316 = vmatprep.subr.bf16.mxu0 %v2717_v21  ;;  %v2725_v28 = vcombine.high %v223_v22, %v227_v24  ;;  %1279 = vmatprep.subr.bf16.mxu1 %v2605_v23  ;;  %v2724_v35 = vcombine.low %v223_v22, %v227_v24 }
  0x59   :  { %v115_v26 = vld [vmem:[#allocation5 + $0x120] sm:$0xff] }
  0x5a   :  { %v231_v30 = vld [vmem:[#allocation5 + $0x4c0] sm:$0xff]  ;;  %v2613_v32 = vcombine.high %v111_v25, %v115_v26  ;;  %v2612_v37 = vcombine.low %v111_v25, %v115_v26 }
  0x5b   :  { %v235_v31 = vld [vmem:[#allocation5 + $0x4e0] sm:$0xff]  ;;  %1317 = vmatpush1.bf16.msra.mxu0 %v2716_v27  ;;  %1280 = vmatpush1.bf16.msra.mxu1 %v2604_v29 }
  0x5c   :  { %v119_v33 = vld [vmem:[#allocation5 + $0x140] sm:$0xff]  ;;  %1318 = vmatprep.subr.bf16.mxu0 %v2725_v28  ;;  %v2733_v36 = vcombine.high %v231_v30, %v235_v31  ;;  %1281 = vmatprep.subr.bf16.mxu1 %v2613_v32  ;;  %v2732_v45 = vcombine.low %v231_v30, %v235_v31 }
  0x5d   :  { %v123_v34 = vld [vmem:[#allocation5 + $0x160] sm:$0xff] }
  0x5e   :  { %v239_v38 = vld [vmem:[#allocation5 + $0x500] sm:$0xff]  ;;  %v2621_v41 = vcombine.high %v119_v33, %v123_v34  ;;  %v2620_v47 = vcombine.low %v119_v33, %v123_v34 }
  0x5f   :  { %v243_v39 = vld [vmem:[#allocation5 + $0x520] sm:$0xff]  ;;  %1319 = vmatpush1.bf16.msra.mxu0 %v2724_v35  ;;  %1282 = vmatpush1.bf16.msra.mxu1 %v2612_v37  ;;  %v84_v37 = vld [vmem:[#allocation5 + $0x28] sm:$0xff] }
  0x60   :  { %v127_v43 = vld [vmem:[#allocation5 + $0x180] sm:$0xff]  ;;  %1320 = vmatprep.subr.bf16.mxu0 %v2733_v36  ;;  %v2741_v46 = vcombine.high %v239_v38, %v243_v39  ;;  %1283 = vmatprep.subr.bf16.mxu1 %v2621_v41  ;;  %v2740_v53 = vcombine.low %v239_v38, %v243_v39  ;;  %v80_v36 = vld [vmem:[#allocation5 + $0x8] sm:$0xff] }
  0x61   :  { %v131_v44 = vld [vmem:[#allocation5 + $0x1a0] sm:$0xff]  ;;  %v73_v39 = vld [vmem:[#allocation2] sm:$0xff] }
  0x62   :  { %v247_v48 = vld [vmem:[#allocation5 + $0x540] sm:$0xff]  ;;  %v2629_v50 = vcombine.high %v127_v43, %v131_v44  ;;  %v2628_v55 = vcombine.low %v127_v43, %v131_v44  ;;  %v88_v41 = vld [vmem:[#allocation5 + $0x48] sm:$0xff]  ;;  %v2583_v44 = vcombine.high %v80_v36, %v84_v37 }
  0x63   :  { %v251_v49 = vld [vmem:[#allocation5 + $0x560] sm:$0xff]  ;;  %1321 = vmatpush1.bf16.msra.mxu0 %v2732_v45  ;;  %1284 = vmatpush1.bf16.msra.mxu1 %v2620_v47  ;;  %v92_v43 = vld [vmem:[#allocation5 + $0x68] sm:$0xff]  ;;  %v209_v45 = vld [vmem:[#allocation5 + $0x410] sm:$0xff]  ;;  %v3350_v47 = vpack.c.bf16 %v73_v39, %v73_v39 }
  0x64   :  { %v135_v51 = vld [vmem:[#allocation5 + $0x1c0] sm:$0xff]  ;;  %1322 = vmatprep.subr.bf16.mxu0 %v2741_v46  ;;  %v2749_v54 = vcombine.high %v247_v48, %v251_v49  ;;  %1285 = vmatprep.subr.bf16.mxu1 %v2629_v50  ;;  %v2748_v61 = vcombine.low %v247_v48, %v251_v49  ;;  %v213_v46 = vld [vmem:[#allocation5 + $0x430] sm:$0xff]  ;;  %v2582_v49 = vcombine.low %v80_v36, %v84_v37  ;;  %v96_v50 = vld [vmem:[#allocation5 + $0x88] sm:$0xff] }
  0x65   :  { %v139_v52 = vld [vmem:[#allocation5 + $0x1e0] sm:$0xff]  ;;  %v2713_v48 = vcombine.high %v209_v45, %v213_v46  ;;  %v144_v36 = vld [vmem:[#allocation5 + $0x208] sm:$0xff] }
  0x66   :  { %v255_v56 = vld [vmem:[#allocation5 + $0x580] sm:$0xff]  ;;  %v2637_v58 = vcombine.high %v135_v51, %v139_v52  ;;  %v2636_v63 = vcombine.low %v135_v51, %v139_v52  ;;  %v100_v51 = vld [vmem:[#allocation5 + $0xa8] sm:$0xff]  ;;  %v2712_v52 = vcombine.low %v209_v45, %v213_v46 }
  0x67   :  { %v259_v57 = vld [vmem:[#allocation5 + $0x5a0] sm:$0xff]  ;;  %1323 = vmatpush1.bf16.msra.mxu0 %v2740_v53  ;;  %1286 = vmatpush1.bf16.msra.mxu1 %v2628_v55  ;;  %v2591_v53 = vcombine.high %v88_v41, %v92_v43  ;;  %v221_v55 = vld [vmem:[#allocation5 + $0x470] sm:$0xff]  ;;  %v148_v37 = vld [vmem:[#allocation5 + $0x228] sm:$0xff] }
  0x68   :  { %v143_v59 = vld [vmem:[#allocation5 + $0x200] sm:$0xff]  ;;  %1324 = vmatprep.subr.bf16.mxu0 %v2749_v54  ;;  %v2757_v62 = vcombine.high %v255_v56, %v259_v57  ;;  %1287 = vmatprep.subr.bf16.mxu1 %v2637_v58  ;;  %v2756_v6 = vcombine.low %v255_v56, %v259_v57  ;;  %v217_v54 = vld [vmem:[#allocation5 + $0x450] sm:$0xff]  ;;  %v2590_v57 = vcombine.low %v88_v41, %v92_v43  ;;  %v104_v58 = vld [vmem:[#allocation5 + $0xc8] sm:$0xff] }
  0x69   :  { %v147_v60 = vld [vmem:[#allocation5 + $0x220] sm:$0xff]  ;;  %v2721_v56 = vcombine.high %v217_v54, %v221_v55  ;;  %v269_v41 = vld [vmem:[#allocation5 + $0x5f0] sm:$0xff]  ;;  %v2647_v46 = vcombine.high %v144_v36, %v148_v37 }
  0x6a   :  { %v263_v1 = vld [vmem:[#allocation5 + $0x5c0] sm:$0xff]  ;;  %v2645_v3 = vcombine.high %v143_v59, %v147_v60  ;;  %v2644_v8 = vcombine.low %v143_v59, %v147_v60  ;;  %v108_v59 = vld [vmem:[#allocation5 + $0xe8] sm:$0xff]  ;;  %v2720_v60 = vcombine.low %v217_v54, %v221_v55 }
  0x6b   :  { %v267_v2 = vld [vmem:[#allocation5 + $0x5e0] sm:$0xff]  ;;  %1325 = vmatpush1.bf16.msra.mxu0 %v2748_v61  ;;  %1288 = vmatpush1.bf16.msra.mxu1 %v2636_v63  ;;  %v2599_v61 = vcombine.high %v96_v50, %v100_v51  ;;  %v229_v63 = vld [vmem:[#allocation5 + $0x4b0] sm:$0xff]  ;;  %v160_v54 = vld [vmem:[#allocation5 + $0x288] sm:$0xff] }
  0x6c   :  { %v151_v4 = vld [vmem:[#allocation5 + $0x240] sm:$0xff]  ;;  %1326 = vmatprep.subr.bf16.mxu0 %v2757_v62  ;;  %v2765_v7 = vcombine.high %v263_v1, %v267_v2  ;;  %1289 = vmatprep.subr.bf16.mxu1 %v2645_v3  ;;  %v2764_v13 = vcombine.low %v263_v1, %v267_v2  ;;  %v225_v62 = vld [vmem:[#allocation5 + $0x490] sm:$0xff]  ;;  %v2598_v2 = vcombine.low %v96_v50, %v100_v51  ;;  %v112_v3 = vld [vmem:[#allocation5 + $0x108] sm:$0xff] }
  0x6d   :  { %v155_v5 = vld [vmem:[#allocation5 + $0x260] sm:$0xff]  ;;  %v2729_v1 = vcombine.high %v225_v62, %v229_v63  ;;  %v2946_v50 = vld [vmem:[#allocation8 + $0x4] ss:$8 sps:$4 sm:$0xff]   ;;  %v2646_v51 = vcombine.low %v144_v36, %v148_v37 }
  0x6e   :  { %v159_v9 = vld [vmem:[#allocation5 + $0x280] sm:$0xff]  ;;  %v2653_v10 = vcombine.high %v151_v4, %v155_v5  ;;  %v2652_v14 = vcombine.low %v151_v4, %v155_v5  ;;  %v116_v4 = vld [vmem:[#allocation5 + $0x128] sm:$0xff]  ;;  %v2728_v5 = vcombine.low %v225_v62, %v229_v63 }
  0x6f   :  { %v163_v11 = vld [vmem:[#allocation5 + $0x2a0] sm:$0xff]  ;;  %1327 = vmatpush1.bf16.msra.mxu0 %v2756_v6  ;;  %1290 = vmatpush1.bf16.msra.mxu1 %v2644_v8  ;;  %v2607_v6 = vcombine.high %v104_v58, %v108_v59  ;;  %v237_v8 = vld [vmem:[#allocation5 + $0x4f0] sm:$0xff]  ;;  %v164_v55 = vld [vmem:[#allocation5 + $0x2a8] sm:$0xff] }
  0x70   :  { %1328 = vmatprep.subr.bf16.mxu0 %v2765_v7  ;;  %v167_v15 = vld [vmem:[#allocation5 + $0x2c0] sm:$0xff]  ;;  %1291 = vmatprep.subr.bf16.mxu1 %v2653_v10  ;;  %v2661_v17 = vcombine.high %v159_v9, %v163_v11  ;;  %v2660_v19 = vcombine.low %v159_v9, %v163_v11  ;;  %v233_v7 = vld [vmem:[#allocation5 + $0x4d0] sm:$0xff]  ;;  %v2606_v10 = vcombine.low %v104_v58, %v108_v59  ;;  %v120_v11 = vld [vmem:[#allocation5 + $0x148] sm:$0xff] }
  0x71   :  { %v171_v16 = vld [vmem:[#allocation5 + $0x2e0] sm:$0xff]  ;;  %v2737_v9 = vcombine.high %v233_v7, %v237_v8  ;;  %v2663_v59 = vcombine.high %v160_v54, %v164_v55  ;;  %v2952_v62 = vld [vmem:[#allocation8 + $0x24] ss:$8 sps:$4 sm:$0xff]   ;;  %v2662_v63 = vcombine.low %v160_v54, %v164_v55 }
  0x72   :  { %v175_v20 = vld [vmem:[#allocation5 + $0x300] sm:$0xff]  ;;  %v2669_v22 = vcombine.high %v167_v15, %v171_v16  ;;  %v2668_v23 = vcombine.low %v167_v15, %v171_v16  ;;  %v241_v15 = vld [vmem:[#allocation5 + $0x510] sm:$0xff]  ;;  %v240_v54 = vld [vmem:[#allocation5 + $0x508] sm:$0xff] }
  0x73   :  { %1329 = vmatpush1.bf16.msra.mxu0 %v2764_v13  ;;  %1292 = vmatpush1.bf16.msra.mxu1 %v2652_v14  ;;  %v179_v21 = vld [vmem:[#allocation5 + $0x320] sm:$0xff]  ;;  %v2736_v13 = vcombine.low %v233_v7, %v237_v8  ;;  %v2615_v14 = vcombine.high %v112_v3, %v116_v4  ;;  %v245_v16 = vld [vmem:[#allocation5 + $0x530] sm:$0xff]  ;;  %v244_v55 = vld [vmem:[#allocation5 + $0x528] sm:$0xff] }
  0x74   :  { %1293 = vmatprep.subr.bf16.mxu1 %v2661_v17  ;;  %v183_v24 = vld [vmem:[#allocation5 + $0x340] sm:$0xff]  ;;  %v2677_v26 = vcombine.high %v175_v20, %v179_v21  ;;  %v2676_v27 = vcombine.low %v175_v20, %v179_v21  ;;  %1478 = vmatprep.subr.bf16.mxu0 %v2713_v48  ;;  %v2745_v17 = vcombine.high %v241_v15, %v245_v16  ;;  %v128_v20 = vld [vmem:[#allocation5 + $0x188] sm:$0xff] }
  0x75   :  { %v187_v25 = vld [vmem:[#allocation5 + $0x360] sm:$0xff]  ;;  %v132_v21 = vld [vmem:[#allocation5 + $0x1a8] sm:$0xff] }
  0x76   :  { %1347 = vmatmul.mubr.bf16.vlgmr.msra.gmra.mrb[0].mxu0 %v3346_v18  ;;  %v191_v28 = vld [vmem:[#allocation5 + $0x380] sm:$0xff]  ;;  %v2685_v30 = vcombine.high %v183_v24, %v187_v25  ;;  %v2684_v31 = vcombine.low %v183_v24, %v187_v25  ;;  %v249_v24 = vld [vmem:[#allocation5 + $0x550] sm:$0xff]  ;;  %v152_v48 = vld [vmem:[#allocation5 + $0x248] sm:$0xff] }
  0x77   :  { %1510 = vmatprep.mubr.bf16.mxu0 %v3262_v0  ;;  %1294 = vmatpush1.bf16.msra.mxu1 %v2660_v19  ;;  %v195_v29 = vld [vmem:[#allocation5 + $0x3a0] sm:$0xff]  ;;  %v2614_v19 = vcombine.low %v112_v3, %v116_v4  ;;  %v253_v25 = vld [vmem:[#allocation5 + $0x570] sm:$0xff]  ;;  %v176_v3 = vld [vmem:[#allocation5 + $0x308] sm:$0xff] }
  0x78   :  { %1295 = vmatprep.subr.bf16.mxu1 %v2669_v22  ;;  %v199_v32 = vld [vmem:[#allocation5 + $0x3c0] sm:$0xff]  ;;  %v2693_v34 = vcombine.high %v191_v28, %v195_v29  ;;  %v2692_v35 = vcombine.low %v191_v28, %v195_v29  ;;  %1479 = vmatpush1.bf16.msra.mxu0 %v2712_v52  ;;  %v2744_v22 = vcombine.low %v241_v15, %v245_v16  ;;  %v136_v28 = vld [vmem:[#allocation5 + $0x1c8] sm:$0xff] }
  0x79   :  { %v203_v33 = vld [vmem:[#allocation5 + $0x3e0] sm:$0xff]  ;;  %1480 = vmatprep.subr.bf16.mxu0 %v2721_v56  ;;  %v140_v29 = vld [vmem:[#allocation5 + $0x1e8] sm:$0xff] }
  0x7a   :  { %v2701_v38 = vcombine.high %v199_v32, %v203_v33  ;;  %v2700_v40 = vcombine.low %v199_v32, %v203_v33  ;;  %v257_v32 = vld [vmem:[#allocation5 + $0x590] sm:$0xff]  ;;  %v2639_v39 = vcombine.high %v136_v28, %v140_v29  ;;  %v2949_v56 = vld [vmem:[#allocation8 + $0x14] ss:$8 sps:$4 sm:$0xff]   ;;  %v2947_v58 = vld [vmem:[#allocation8 + $0x10] ss:$8 sps:$4 sm:$0xff]  }
  0x7b   :  { %1296 = vmatpush1.bf16.msra.mxu1 %v2668_v23  ;;  %v2623_v23 = vcombine.high %v120_v11, %v124_v12  ;;  %v261_v33 = vld [vmem:[#allocation5 + $0x5b0] sm:$0xff]  ;;  %v180_v4 = vld [vmem:[#allocation5 + $0x328] sm:$0xff]  ;;  %v2953_v7 = vld [vmem:[#allocation8 + $0x30] ss:$8 sps:$4 sm:$0xff]  }
  0x7c   :  { %1297 = vmatprep.subr.bf16.mxu1 %v2677_v26  ;;  %1481 = vmatpush1.bf16.msra.mxu0 %v2720_v60  ;;  %v2753_v26 = vcombine.high %v249_v24, %v253_v25  ;;  %v2944_v52 = vld [vmem:[#allocation8] ss:$8 sps:$4 sm:$0xff]   ;;  %v2679_v8 = vcombine.high %v176_v3, %v180_v4  ;;  %v2970_v36 = vld [vmem:[#allocation8 + $0x84] ss:$8 sps:$4 sm:$0xff]  }
  0x7d   :  { %1482 = vmatprep.subr.bf16.mxu0 %v2729_v1  ;;  %v168_v60 = vld [vmem:[#allocation5 + $0x2c8] sm:$0xff] }
  0x7e   :  { %v2950_v1 = vld [vmem:[#allocation8 + $0x20] ss:$8 sps:$4 sm:$0xff]  }
  0x7f   :  { %1298 = vmatpush1.bf16.msra.mxu1 %v2676_v27  ;;  %v2622_v27 = vcombine.low %v120_v11, %v124_v12  ;;  %v2958_v11 = vld [vmem:[#allocation8 + $0x44] ss:$8 sps:$4 sm:$0xff]   ;;  %v2678_v12 = vcombine.low %v176_v3, %v180_v4 }
  0x80   :  { %1299 = vmatprep.subr.bf16.mxu1 %v2685_v30  ;;  %1483 = vmatpush1.bf16.msra.mxu0 %v2728_v5  ;;  %v2752_v30 = vcombine.low %v249_v24, %v253_v25  ;;  %v2955_v5 = vld [vmem:[#allocation8 + $0x34] ss:$8 sps:$4 sm:$0xff]   ;;  %v192_v15 = vld [vmem:[#allocation5 + $0x388] sm:$0xff] }
  0x81   :  { %1484 = vmatprep.subr.bf16.mxu0 %v2737_v9  ;;  %v184_v9 = vld [vmem:[#allocation5 + $0x348] sm:$0xff] }
  0x82   :  { %v196_v16 = vld [vmem:[#allocation5 + $0x3a8] sm:$0xff] }
  0x83   :  { %1300 = vmatpush1.bf16.msra.mxu1 %v2684_v31  ;;  %v2631_v31 = vcombine.high %v128_v20, %v132_v21  ;;  %v2964_v24 = vld [vmem:[#allocation8 + $0x64] ss:$8 sps:$4 sm:$0xff]   ;;  %v2694_v25 = vcombine.low %v192_v15, %v196_v16 }
  0x84   :  { %1301 = vmatprep.subr.bf16.mxu1 %v2693_v34  ;;  %1485 = vmatpush1.bf16.msra.mxu0 %v2736_v13  ;;  %v2761_v34 = vcombine.high %v257_v32, %v261_v33  ;;  %v2956_v13 = vld [vmem:[#allocation8 + $0x40] ss:$8 sps:$4 sm:$0xff]  }
  0x85   :  { %1486 = vmatprep.subr.bf16.mxu0 %v2745_v17  ;;  %v2961_v17 = vld [vmem:[#allocation8 + $0x54] ss:$8 sps:$4 sm:$0xff]   ;;  %v256_v3 = vld [vmem:[#allocation5 + $0x588] sm:$0xff] }
  0x86   :  { %v260_v4 = vld [vmem:[#allocation5 + $0x5a8] sm:$0xff] }
  0x87   :  { %1302 = vmatpush1.bf16.msra.mxu1 %v2692_v35  ;;  %v2630_v35 = vcombine.low %v128_v20, %v132_v21  ;;  %v2959_v20 = vld [vmem:[#allocation8 + $0x50] ss:$8 sps:$4 sm:$0xff]   ;;  %v2695_v21 = vcombine.high %v192_v15, %v196_v16  ;;  %v81_v15 = vld [vmem:[#allocation5 + $0x10] sm:$0xff] }
  0x88   :  { %1303 = vmatprep.subr.bf16.mxu1 %v2701_v38  ;;  %1487 = vmatpush1.bf16.msra.mxu0 %v2744_v22  ;;  %v2760_v38 = vcombine.low %v257_v32, %v261_v33  ;;  %v200_v22 = vld [vmem:[#allocation5 + $0x3c8] sm:$0xff]  ;;  %v2965_v32 = vld [vmem:[#allocation8 + $0x70] ss:$8 sps:$4 sm:$0xff]   ;;  %v85_v16 = vld [vmem:[#allocation5 + $0x30] sm:$0xff] }
  0x89   :  { %1488 = vmatprep.subr.bf16.mxu0 %v2753_v26  ;;  %v2962_v26 = vld [vmem:[#allocation8 + $0x60] ss:$8 sps:$4 sm:$0xff]  }
  0x8b   :  { %1304 = vmatpush1.bf16.msra.mxu1 %v2700_v40  ;;  %v265_v40 = vld [vmem:[#allocation5 + $0x5d0] sm:$0xff] }
  0x8c   :  { %1355 = vmatprep.subr.bf16.mxu1 %v2583_v44  ;;  %1489 = vmatpush1.bf16.msra.mxu0 %v2752_v30  ;;  %v2769_v43 = vcombine.high %v265_v40, %v269_v41  ;;  %v2638_v44 = vcombine.low %v136_v28, %v140_v29  ;;  %v2768_v45 = vcombine.low %v265_v40, %v269_v41  ;;  %v208_v28 = vld [vmem:[#allocation5 + $0x408] sm:$0xff]  ;;  %v2967_v30 = vld [vmem:[#allocation8 + $0x74] ss:$8 sps:$4 sm:$0xff]  }
  0x8d   :  { %1490 = vmatprep.subr.bf16.mxu0 %v2761_v34  ;;  %v212_v29 = vld [vmem:[#allocation5 + $0x428] sm:$0xff] }
  0x8e   :  { %1306 = vmatmul.mubr.bf16.vlgmr.msra.gmra.mrb[0].mxu1 %v3350_v47  ;;  %v2711_v33 = vcombine.high %v208_v28, %v212_v29  ;;  %v216_v34 = vld [vmem:[#allocation5 + $0x448] sm:$0xff]  ;;  %v2710_v37 = vcombine.low %v208_v28, %v212_v29 }
  0x8f   :  { %1356 = vmatpush1.bf16.msra.mxu1 %v2582_v49  ;;  %1387 = vmatprep.mubr.bf16.mxu1 %v3343_v42  ;;  %v156_v49 = vld [vmem:[#allocation5 + $0x268] sm:$0xff] }
  0x90   :  { %1357 = vmatprep.subr.bf16.mxu1 %v2591_v53  ;;  %1491 = vmatpush1.bf16.msra.mxu0 %v2760_v38  ;;  %v2655_v53 = vcombine.high %v152_v48, %v156_v49  ;;  %v2968_v38 = vld [vmem:[#allocation8 + $0x80] ss:$8 sps:$4 sm:$0xff]  }
  0x91   :  { %1492 = vmatprep.subr.bf16.mxu0 %v2769_v43  ;;  %v224_v40 = vld [vmem:[#allocation5 + $0x488] sm:$0xff]  ;;  %v2973_v43 = vld [vmem:[#allocation8 + $0x94] ss:$8 sps:$4 sm:$0xff]  }
  0x92   :  { %v228_v41 = vld [vmem:[#allocation5 + $0x4a8] sm:$0xff] }
  0x93   :  { %1358 = vmatpush1.bf16.msra.mxu1 %v2590_v57  ;;  %v2654_v57 = vcombine.low %v152_v48, %v156_v49  ;;  %v232_v48 = vld [vmem:[#allocation5 + $0x4c8] sm:$0xff] }
  0x94   :  { %1359 = vmatprep.subr.bf16.mxu1 %v2599_v61  ;;  %1493 = vmatpush1.bf16.msra.mxu0 %v2768_v45  ;;  %v172_v61 = vld [vmem:[#allocation5 + $0x2e8] sm:$0xff]  ;;  %v2971_v45 = vld [vmem:[#allocation8 + $0x90] ss:$8 sps:$4 sm:$0xff]  }
  0x95   :  { %2397 = vmatprep.subr.bf16.mxu0 %v2946_v50  ;;  %v236_v49 = vld [vmem:[#allocation5 + $0x4e8] sm:$0xff] }
  0x96   :  { %v2976_v50 = vld [vmem:[#allocation8 + $0xa4] ss:$8 sps:$4 sm:$0xff]  }
  0x97   :  { %1360 = vmatpush1.bf16.msra.mxu1 %v2598_v2  ;;  %1511 = vmatmul.mubr.bf16.vlgmr.msra.gmra.mrb[4].mxu0 %v3346_v18  ;;  %v2671_v2 = vcombine.high %v168_v60, %v172_v61 }
  0x98   :  { %1361 = vmatprep.subr.bf16.mxu1 %v2607_v6  ;;  %2398 = vmatpush1.bf16.msra.mxu0 %v2944_v52  ;;  %v2670_v6 = vcombine.low %v168_v60, %v172_v61  ;;  %v2974_v52 = vld [vmem:[#allocation8 + $0xa0] ss:$8 sps:$4 sm:$0xff]  }
  0x99   :  { %2399 = vmatprep.subr.bf16.mxu0 %v2949_v56  ;;  %v2979_v56 = vld [vmem:[#allocation8 + $0xb4] ss:$8 sps:$4 sm:$0xff]   ;;  %v248_v60 = vld [vmem:[#allocation5 + $0x548] sm:$0xff] }
  0x9a   :  { %v252_v61 = vld [vmem:[#allocation5 + $0x568] sm:$0xff] }
  0x9b   :  { %1362 = vmatpush1.bf16.msra.mxu1 %v2606_v10  ;;  %v188_v10 = vld [vmem:[#allocation5 + $0x368] sm:$0xff] }
  0x9c   :  { %1363 = vmatprep.subr.bf16.mxu1 %v2615_v14  ;;  %2400 = vmatpush1.bf16.msra.mxu0 %v2947_v58  ;;  %v2687_v14 = vcombine.high %v184_v9, %v188_v10  ;;  %v2977_v58 = vld [vmem:[#allocation8 + $0xb0] ss:$8 sps:$4 sm:$0xff]  }
  0x9d   :  { %2401 = vmatprep.subr.bf16.mxu0 %v2952_v62  ;;  %v2982_v62 = vld [vmem:[#allocation8 + $0xc4] ss:$8 sps:$4 sm:$0xff]  }
  0x9f   :  { %1364 = vmatpush1.bf16.msra.mxu1 %v2614_v19  ;;  %v2686_v19 = vcombine.low %v184_v9, %v188_v10  ;;  %v264_v9 = vld [vmem:[#allocation5 + $0x5c8] sm:$0xff] }
  0xa0   :  { %1365 = vmatprep.subr.bf16.mxu1 %v2623_v23  ;;  %2402 = vmatpush1.bf16.msra.mxu0 %v2950_v1  ;;  %v204_v23 = vld [vmem:[#allocation5 + $0x3e8] sm:$0xff] }
  0xa1   :  { %2403 = vmatprep.subr.bf16.mxu0 %v2955_v5  ;;  %v2980_v1 = vld [vmem:[#allocation8 + $0xc0] ss:$8 sps:$4 sm:$0xff]   ;;  %v2985_v5 = vld [vmem:[#allocation8 + $0xd4] ss:$8 sps:$4 sm:$0xff]  }
  0xa2   :  { %v268_v10 = vld [vmem:[#allocation5 + $0x5e8] sm:$0xff] }
  0xa3   :  { %1366 = vmatpush1.bf16.msra.mxu1 %v2622_v27  ;;  %v2703_v27 = vcombine.high %v200_v22, %v204_v23 }
  0xa4   :  { %1367 = vmatprep.subr.bf16.mxu1 %v2631_v31  ;;  %2404 = vmatpush1.bf16.msra.mxu0 %v2953_v7  ;;  %v2702_v31 = vcombine.low %v200_v22, %v204_v23  ;;  %v2983_v7 = vld [vmem:[#allocation8 + $0xd0] ss:$8 sps:$4 sm:$0xff]   ;;  %v89_v22 = vld [vmem:[#allocation5 + $0x50] sm:$0xff] }
  0xa5   :  { %2405 = vmatprep.subr.bf16.mxu0 %v2958_v11  ;;  %v2988_v11 = vld [vmem:[#allocation8 + $0xe4] ss:$8 sps:$4 sm:$0xff]  }
  0xa6   :  { %v93_v23 = vld [vmem:[#allocation5 + $0x70] sm:$0xff] }
  0xa7   :  { %1368 = vmatpush1.bf16.msra.mxu1 %v2630_v35  ;;  %v220_v35 = vld [vmem:[#allocation5 + $0x468] sm:$0xff]  ;;  %v2592_v28 = vcombine.low %v89_v22, %v93_v23 }
  0xa8   :  { %1369 = vmatprep.subr.bf16.mxu1 %v2639_v39  ;;  %2406 = vmatpush1.bf16.msra.mxu0 %v2956_v13  ;;  %v2719_v39 = vcombine.high %v216_v34, %v220_v35  ;;  %v2986_v13 = vld [vmem:[#allocation8 + $0xe0] ss:$8 sps:$4 sm:$0xff]  }
  0xa9   :  { %2407 = vmatprep.subr.bf16.mxu0 %v2961_v17  ;;  %v2991_v17 = vld [vmem:[#allocation8 + $0xf4] ss:$8 sps:$4 sm:$0xff]  }
  0xab   :  { %1370 = vmatpush1.bf16.msra.mxu1 %v2638_v44  ;;  %v2718_v44 = vcombine.low %v216_v34, %v220_v35  ;;  %v113_v34 = vld [vmem:[#allocation5 + $0x110] sm:$0xff] }
  0xac   :  { %1371 = vmatprep.subr.bf16.mxu1 %v2647_v46  ;;  %2408 = vmatpush1.bf16.msra.mxu0 %v2959_v20  ;;  %v2727_v46 = vcombine.high %v224_v40, %v228_v41  ;;  %v2989_v20 = vld [vmem:[#allocation8 + $0xf0] ss:$8 sps:$4 sm:$0xff]   ;;  %v117_v35 = vld [vmem:[#allocation5 + $0x130] sm:$0xff] }
  0xad   :  { %2409 = vmatprep.subr.bf16.mxu0 %v2964_v24  ;;  %v2584_v24 = vcombine.low %v81_v15, %v85_v16 }
  0xaf   :  { %1372 = vmatpush1.bf16.msra.mxu1 %v2646_v51  ;;  %v2726_v51 = vcombine.low %v224_v40, %v228_v41  ;;  %v2616_v40 = vcombine.low %v113_v34, %v117_v35 }
  0xb0   :  { %1373 = vmatprep.subr.bf16.mxu1 %v2655_v53  ;;  %2410 = vmatpush1.bf16.msra.mxu0 %v2962_v26  ;;  %v2735_v53 = vcombine.high %v232_v48, %v236_v49  ;;  %v97_v26 = vld [vmem:[#allocation5 + $0x90] sm:$0xff] }
  0xb1   :  { %2411 = vmatprep.subr.bf16.mxu0 %v2967_v30  ;;  %v105_v30 = vld [vmem:[#allocation5 + $0xd0] sm:$0xff] }
  0xb3   :  { %1374 = vmatpush1.bf16.msra.mxu1 %v2654_v57  ;;  %v2734_v57 = vcombine.low %v232_v48, %v236_v49  ;;  %v137_v48 = vld [vmem:[#allocation5 + $0x1d0] sm:$0xff] }
  0xb4   :  { %1375 = vmatprep.subr.bf16.mxu1 %v2663_v59  ;;  %2412 = vmatpush1.bf16.msra.mxu0 %v2965_v32  ;;  %v2743_v59 = vcombine.high %v240_v54, %v244_v55  ;;  %v141_v49 = vld [vmem:[#allocation5 + $0x1f0] sm:$0xff] }
  0xb5   :  { %2413 = vmatprep.subr.bf16.mxu0 %v2970_v36 }
  0xb7   :  { %1376 = vmatpush1.bf16.msra.mxu1 %v2662_v63  ;;  %v2742_v63 = vcombine.low %v240_v54, %v244_v55  ;;  %v2640_v54 = vcombine.low %v137_v48, %v141_v49 }
  0xb8   :  { %1377 = vmatprep.subr.bf16.mxu1 %v2671_v2  ;;  %2414 = vmatpush1.bf16.msra.mxu0 %v2968_v38  ;;  %v2751_v2 = vcombine.high %v248_v60, %v252_v61  ;;  %v121_v38 = vld [vmem:[#allocation5 + $0x150] sm:$0xff] }
  0xb9   :  { %2415 = vmatprep.subr.bf16.mxu0 %v2973_v43  ;;  %v129_v43 = vld [vmem:[#allocation5 + $0x190] sm:$0xff] }
  0xbb   :  { %1378 = vmatpush1.bf16.msra.mxu1 %v2670_v6  ;;  %v2750_v6 = vcombine.low %v248_v60, %v252_v61  ;;  %v161_v61 = vld [vmem:[#allocation5 + $0x290] sm:$0xff] }
  0xbc   :  { %1379 = vmatprep.subr.bf16.mxu1 %v2679_v8  ;;  %2416 = vmatpush1.bf16.msra.mxu0 %v2971_v45  ;;  %v2759_v8 = vcombine.high %v256_v3, %v260_v4 }
  0xbd   :  { %2417 = vmatprep.subr.bf16.mxu0 %v2976_v50 }
  0xbf   :  { %1380 = vmatpush1.bf16.msra.mxu1 %v2678_v12  ;;  %v2758_v12 = vcombine.low %v256_v3, %v260_v4  ;;  %v173_v3 = vld [vmem:[#allocation5 + $0x2f0] sm:$0xff] }
  0xc0   :  { %1381 = vmatprep.subr.bf16.mxu1 %v2687_v14  ;;  %2418 = vmatpush1.bf16.msra.mxu0 %v2974_v52  ;;  %v2767_v14 = vcombine.high %v264_v9, %v268_v10  ;;  %v145_v52 = vld [vmem:[#allocation5 + $0x210] sm:$0xff] }
  0xc1   :  { %2419 = vmatprep.subr.bf16.mxu0 %v2979_v56  ;;  %v2994_v56 = vld [vmem:[#allocation8 + $0x104] ss:$8 sps:$4 sm:$0xff]  }
  0xc3   :  { %1382 = vmatpush1.bf16.msra.mxu1 %v2686_v19  ;;  %v2766_v19 = vcombine.low %v264_v9, %v268_v10  ;;  %v185_v10 = vld [vmem:[#allocation5 + $0x350] sm:$0xff] }
  0xc4   :  { %1383 = vmatprep.subr.bf16.mxu1 %v2695_v21  ;;  %2420 = vmatpush1.bf16.msra.mxu0 %v2977_v58  ;;  %v2585_v21 = vcombine.high %v81_v15, %v85_v16  ;;  %v157_v58 = vld [vmem:[#allocation5 + $0x270] sm:$0xff] }
  0xc5   :  { %2421 = vmatprep.subr.bf16.mxu0 %v2982_v62  ;;  %v165_v62 = vld [vmem:[#allocation5 + $0x2b0] sm:$0xff] }
  0xc6   :  { %v2664_v4 = vcombine.low %v161_v61, %v165_v62  ;;  %v197_v15 = vld [vmem:[#allocation5 + $0x3b0] sm:$0xff] }
  0xc7   :  { %1384 = vmatpush1.bf16.msra.mxu1 %v2694_v25  ;;  %v2593_v25 = vcombine.high %v89_v22, %v93_v23  ;;  %v82_v23 = vld [vmem:[#allocation5 + $0x18] sm:$0xff] }
  0xc8   :  { %1385 = vmatprep.subr.bf16.mxu1 %v2703_v27  ;;  %2422 = vmatpush1.bf16.msra.mxu0 %v2980_v1  ;;  %v101_v27 = vld [vmem:[#allocation5 + $0xb0] sm:$0xff]  ;;  %v2665_v1 = vcombine.high %v161_v61, %v165_v62  ;;  %v154_v62 = vld [vmem:[#allocation5 + $0x258] sm:$0xff] }
  0xc9   :  { %2423 = vmatprep.subr.bf16.mxu0 %v2985_v5  ;;  %v2601_v29 = vcombine.high %v97_v26, %v101_v27  ;;  %v2600_v32 = vcombine.low %v97_v26, %v101_v27  ;;  %v90_v27 = vld [vmem:[#allocation5 + $0x58] sm:$0xff] }
  0xcb   :  { %1386 = vmatpush1.bf16.msra.mxu1 %v2702_v31  ;;  %v109_v31 = vld [vmem:[#allocation5 + $0xf0] sm:$0xff] }
  0xcc   :  { %1396 = vmatprep.subr.bf16.mxu1 %v2711_v33  ;;  %2424 = vmatpush1.bf16.msra.mxu0 %v2983_v7  ;;  %v2609_v33 = vcombine.high %v105_v30, %v109_v31  ;;  %v2608_v36 = vcombine.low %v105_v30, %v109_v31  ;;  %v181_v7 = vld [vmem:[#allocation5 + $0x330] sm:$0xff]  ;;  %v98_v31 = vld [vmem:[#allocation5 + $0x98] sm:$0xff] }
  0xcd   :  { %2425 = vmatprep.subr.bf16.mxu0 %v2988_v11  ;;  %v189_v11 = vld [vmem:[#allocation5 + $0x370] sm:$0xff] }
  0xce   :  { %1388 = vmatmul.mubr.bf16.vlgmr.msra.gmra.mrb[4].mxu1 %v3350_v47  ;;  %v2688_v16 = vcombine.low %v185_v10, %v189_v11 }
  0xcf   :  { %1397 = vmatpush1.bf16.msra.mxu1 %v2710_v37  ;;  %1428 = vmatprep.mubr.bf16.mxu1 %v3262_v0  ;;  %v2617_v37 = vcombine.high %v113_v34, %v117_v35  ;;  %v106_v35 = vld [vmem:[#allocation5 + $0xd8] sm:$0xff] }
  0xd0   :  { %1398 = vmatprep.subr.bf16.mxu1 %v2719_v39  ;;  %2426 = vmatpush1.bf16.msra.mxu0 %v2986_v13  ;;  %v125_v39 = vld [vmem:[#allocation5 + $0x170] sm:$0xff]  ;;  %v2689_v13 = vcombine.high %v185_v10, %v189_v11  ;;  %v174_v10 = vld [vmem:[#allocation5 + $0x2f8] sm:$0xff]  ;;  %v273_v11 = vlaneseq }
  0xd1   :  { %2427 = vmatprep.subr.bf16.mxu0 %v2991_v17  ;;  %v2625_v41 = vcombine.high %v121_v38, %v125_v39  ;;  %v2624_v45 = vcombine.low %v121_v38, %v125_v39  ;;  %v114_v39 = vld [vmem:[#allocation5 + $0x118] sm:$0xff] }
  0xd3   :  { %1399 = vmatpush1.bf16.msra.mxu1 %v2718_v44  ;;  %v133_v44 = vld [vmem:[#allocation5 + $0x1b0] sm:$0xff] }
  0xd4   :  { %1400 = vmatprep.subr.bf16.mxu1 %v2727_v46  ;;  %2428 = vmatpush1.bf16.msra.mxu0 %v2989_v20  ;;  %v2633_v46 = vcombine.high %v129_v43, %v133_v44  ;;  %v2632_v50 = vcombine.low %v129_v43, %v133_v44  ;;  %v205_v20 = vld [vmem:[#allocation5 + $0x3f0] sm:$0xff]  ;;  %v122_v44 = vld [vmem:[#allocation5 + $0x158] sm:$0xff] }
  0xd5   :  { %2438 = vmatprep.subr.bf16.mxu0 %v2994_v56  ;;  %v146_v56 = vld [vmem:[#allocation5 + $0x218] sm:$0xff] }
  0xd7   :  { %1401 = vmatpush1.bf16.msra.mxu1 %v2726_v51  ;;  %v2641_v51 = vcombine.high %v137_v48, %v141_v49  ;;  %v130_v48 = vld [vmem:[#allocation5 + $0x198] sm:$0xff] }
  0xd8   :  { %1402 = vmatprep.subr.bf16.mxu1 %v2735_v53  ;;  %v149_v53 = vld [vmem:[#allocation5 + $0x230] sm:$0xff]  ;;  %v134_v49 = vld [vmem:[#allocation5 + $0x1b8] sm:$0xff] }
  0xd9   :  { %v2649_v55 = vcombine.high %v145_v52, %v149_v53 }
  0xdb   :  { %1403 = vmatpush1.bf16.msra.mxu1 %v2734_v57  ;;  %v153_v57 = vld [vmem:[#allocation5 + $0x250] sm:$0xff] }
  0xdc   :  { %1404 = vmatprep.subr.bf16.mxu1 %v2743_v59  ;;  %v2648_v59 = vcombine.low %v145_v52, %v149_v53  ;;  %v2657_v60 = vcombine.high %v153_v57, %v157_v58  ;;  %v138_v52 = vld [vmem:[#allocation5 + $0x1d8] sm:$0xff] }
  0xdd   :  { %v142_v53 = vld [vmem:[#allocation5 + $0x1f8] sm:$0xff] }
  0xdf   :  { %1405 = vmatpush1.bf16.msra.mxu1 %v2742_v63  ;;  %v2656_v63 = vcombine.low %v153_v57, %v157_v58  ;;  %v150_v57 = vld [vmem:[#allocation5 + $0x238] sm:$0xff]  ;;  %v2642_v58 = vcombine.low %v138_v52, %v142_v53 }
  0xe0   :  { %1406 = vmatprep.subr.bf16.mxu1 %v2751_v2  ;;  %v169_v2 = vld [vmem:[#allocation5 + $0x2d0] sm:$0xff] }
  0xe1   :  { %v2673_v5 = vcombine.high %v169_v2, %v173_v3 }
  0xe3   :  { %1407 = vmatpush1.bf16.msra.mxu1 %v2750_v6  ;;  %v177_v6 = vld [vmem:[#allocation5 + $0x310] sm:$0xff] }
  0xe4   :  { %1408 = vmatprep.subr.bf16.mxu1 %v2759_v8  ;;  %v2672_v8 = vcombine.low %v169_v2, %v173_v3  ;;  %v2681_v9 = vcombine.high %v177_v6, %v181_v7  ;;  %v2650_v3 = vcombine.low %v146_v56, %v150_v57 }
  0xe7   :  { %1409 = vmatpush1.bf16.msra.mxu1 %v2758_v12  ;;  %v2680_v12 = vcombine.low %v177_v6, %v181_v7  ;;  %v166_v6 = vld [vmem:[#allocation5 + $0x2b8] sm:$0xff] }
  0xe8   :  { %1410 = vmatprep.subr.bf16.mxu1 %v2767_v14  ;;  %v193_v14 = vld [vmem:[#allocation5 + $0x390] sm:$0xff] }
  0xe9   :  { %v2697_v17 = vcombine.high %v193_v14, %v197_v15 }
  0xeb   :  { %1411 = vmatpush1.bf16.msra.mxu1 %v2766_v19  ;;  %v201_v19 = vld [vmem:[#allocation5 + $0x3d0] sm:$0xff] }
  0xec   :  { %1437 = vmatprep.subr.bf16.mxu1 %v2585_v21  ;;  %v2696_v21 = vcombine.low %v193_v14, %v197_v15  ;;  %v2705_v22 = vcombine.high %v201_v19, %v205_v20  ;;  %v178_v14 = vld [vmem:[#allocation5 + $0x318] sm:$0xff] }
  0xed   :  { %v182_v15 = vld [vmem:[#allocation5 + $0x338] sm:$0xff] }
  0xee   :  { %1429 = vmatmul.mubr.bf16.vlgmr.msra.gmra.mrb[4].mxu1 %v3346_v18 }
  0xef   :  { %1438 = vmatpush1.bf16.msra.mxu1 %v2584_v24  ;;  %1469 = vmatprep.mubr.bf16.mxu1 %v3343_v42  ;;  %v86_v24 = vld [vmem:[#allocation5 + $0x38] sm:$0xff] }
  0xf0   :  { %1439 = vmatprep.subr.bf16.mxu1 %v2593_v25  ;;  %v2704_v25 = vcombine.low %v201_v19, %v205_v20  ;;  %v2587_v26 = vcombine.high %v82_v23, %v86_v24  ;;  %v2683_v19 = vcombine.high %v178_v14, %v182_v15  ;;  %v186_v20 = vld [vmem:[#allocation5 + $0x358] sm:$0xff] }
  0xf3   :  { %1440 = vmatpush1.bf16.msra.mxu1 %v2592_v28  ;;  %v94_v28 = vld [vmem:[#allocation5 + $0x78] sm:$0xff] }
  0xf4   :  { %1441 = vmatprep.subr.bf16.mxu1 %v2601_v29  ;;  %v2586_v29 = vcombine.low %v82_v23, %v86_v24  ;;  %v2595_v30 = vcombine.high %v90_v27, %v94_v28  ;;  %v2682_v23 = vcombine.low %v178_v14, %v182_v15  ;;  %v3364_v24 = vld [vmem:[#allocation7] sm:$0xff]  ;;  %v254_v14 = vld [vmem:[#allocation5 + $0x578] sm:$0xff]  ;;  %v3004_v15 = vld [vmem:[#allocation8 + $0x140] ss:$8 sps:$4 sm:$0xff]  }
  0xf7   :  { %1442 = vmatpush1.bf16.msra.mxu1 %v2600_v32  ;;  %v102_v32 = vld [vmem:[#allocation5 + $0xb8] sm:$0xff] }
  0xf8   :  { %1443 = vmatprep.subr.bf16.mxu1 %v2609_v33  ;;  %v2594_v33 = vcombine.low %v90_v27, %v94_v28  ;;  %v2603_v34 = vcombine.high %v98_v31, %v102_v32  ;;  %v194_v27 = vld [vmem:[#allocation5 + $0x398] sm:$0xff] }
  0xf9   :  { %v198_v28 = vld [vmem:[#allocation5 + $0x3b8] sm:$0xff] }
  0xfb   :  { %1444 = vmatpush1.bf16.msra.mxu1 %v2608_v36  ;;  %v110_v36 = vld [vmem:[#allocation5 + $0xf8] sm:$0xff] }
  0xfc   :  { %1445 = vmatprep.subr.bf16.mxu1 %v2617_v37  ;;  %v2602_v37 = vcombine.low %v98_v31, %v102_v32  ;;  %v2611_v38 = vcombine.high %v106_v35, %v110_v36  ;;  %v2699_v32 = vcombine.high %v194_v27, %v198_v28 }
  0xff   :  { %1446 = vmatpush1.bf16.msra.mxu1 %v2616_v40  ;;  %v118_v40 = vld [vmem:[#allocation5 + $0x138] sm:$0xff] }
 0x100   :  { %1447 = vmatprep.subr.bf16.mxu1 %v2625_v41  ;;  %v2610_v41 = vcombine.low %v106_v35, %v110_v36  ;;  %v2619_v43 = vcombine.high %v114_v39, %v118_v40  ;;  %v206_v35 = vld [vmem:[#allocation5 + $0x3f8] sm:$0xff] }
 0x103   :  { %1448 = vmatpush1.bf16.msra.mxu1 %v2624_v45  ;;  %v126_v45 = vld [vmem:[#allocation5 + $0x178] sm:$0xff] }
 0x104   :  { %1449 = vmatprep.subr.bf16.mxu1 %v2633_v46  ;;  %v2618_v46 = vcombine.low %v114_v39, %v118_v40  ;;  %v2698_v40 = vcombine.low %v194_v27, %v198_v28  ;;  %v3012_v27 = vld [vmem:[#allocation8 + $0x164] ss:$8 sps:$4 sm:$0xff]  }
 0x107   :  { %1450 = vmatpush1.bf16.msra.mxu1 %v2632_v50  ;;  %v2626_v50 = vcombine.low %v122_v44, %v126_v45 }
 0x108   :  { %1451 = vmatprep.subr.bf16.mxu1 %v2641_v51  ;;  %v2635_v51 = vcombine.high %v130_v48, %v134_v49 }
 0x10b   :  { %1452 = vmatpush1.bf16.msra.mxu1 %v2640_v54  ;;  %v2634_v54 = vcombine.low %v130_v48, %v134_v49 }
 0x10c   :  { %1453 = vmatprep.subr.bf16.mxu1 %v2649_v55  ;;  %v2643_v55 = vcombine.high %v138_v52, %v142_v53 }
 0x10f   :  { %1454 = vmatpush1.bf16.msra.mxu1 %v2648_v59 }
 0x110   :  { %1455 = vmatprep.subr.bf16.mxu1 %v2657_v60  ;;  %v2651_v60 = vcombine.high %v146_v56, %v150_v57  ;;  %v2992_v56 = vld [vmem:[#allocation8 + $0x100] ss:$8 sps:$4 sm:$0xff]   ;;  %v2997_v57 = vld [vmem:[#allocation8 + $0x114] ss:$8 sps:$4 sm:$0xff]  }
 0x113   :  { %1456 = vmatpush1.bf16.msra.mxu1 %v2656_v63  ;;  %v158_v63 = vld [vmem:[#allocation5 + $0x278] sm:$0xff] }
 0x114   :  { %1457 = vmatprep.subr.bf16.mxu1 %v2665_v1  ;;  %v2658_v7 = vcombine.low %v154_v62, %v158_v63 }
 0x117   :  { %1458 = vmatpush1.bf16.msra.mxu1 %v2664_v4  ;;  %v2659_v4 = vcombine.high %v154_v62, %v158_v63  ;;  %v2995_v62 = vld [vmem:[#allocation8 + $0x110] ss:$8 sps:$4 sm:$0xff]   ;;  %v3000_v63 = vld [vmem:[#allocation8 + $0x124] ss:$8 sps:$4 sm:$0xff]  }
 0x118   :  { %1459 = vmatprep.subr.bf16.mxu1 %v2673_v5  ;;  %v162_v5 = vld [vmem:[#allocation5 + $0x298] sm:$0xff] }
 0x11b   :  { %1460 = vmatpush1.bf16.msra.mxu1 %v2672_v8  ;;  %v2667_v8 = vcombine.high %v162_v5, %v166_v6 }
 0x11c   :  { %1461 = vmatprep.subr.bf16.mxu1 %v2681_v9  ;;  %v170_v9 = vld [vmem:[#allocation5 + $0x2d8] sm:$0xff] }
 0x11f   :  { %1462 = vmatpush1.bf16.msra.mxu1 %v2680_v12  ;;  %v2666_v12 = vcombine.low %v162_v5, %v166_v6  ;;  %v2998_v5 = vld [vmem:[#allocation8 + $0x120] ss:$8 sps:$4 sm:$0xff]   ;;  %v3003_v6 = vld [vmem:[#allocation8 + $0x134] ss:$8 sps:$4 sm:$0xff]  }
 0x120   :  { %1463 = vmatprep.subr.bf16.mxu1 %v2689_v13  ;;  %v2675_v13 = vcombine.high %v170_v9, %v174_v10 }
 0x123   :  { %1464 = vmatpush1.bf16.msra.mxu1 %v2688_v16  ;;  %v3361_v16 = vshrl.u32 %v273_v11, 7  ;;  %v3006_v11 = vld [vmem:[#allocation8 + $0x144] ss:$8 sps:$4 sm:$0xff]  }
 0x124   :  { %1465 = vmatprep.subr.bf16.mxu1 %v2697_v17  ;;  %v2674_v17 = vcombine.low %v170_v9, %v174_v10  ;;  %v242_v9 = vld [vmem:[#allocation5 + $0x518] sm:$0xff] }
 0x125   :  { %v3001_v10 = vld [vmem:[#allocation8 + $0x130] ss:$8 sps:$4 sm:$0xff]  }
 0x127   :  { %1466 = vmatpush1.bf16.msra.mxu1 %v2696_v21  ;;  %v190_v21 = vld [vmem:[#allocation5 + $0x378] sm:$0xff] }
 0x128   :  { %1467 = vmatprep.subr.bf16.mxu1 %v2705_v22  ;;  %v275_v22 = vsub.s32 0, %v3361_v16  ;;  %v2690_v31 = vcombine.low %v186_v20, %v190_v21 }
 0x12b   :  { %1468 = vmatpush1.bf16.msra.mxu1 %v2704_v25  ;;  %v279_v25 = vsub.s32 1, %v3361_v16 }
 0x12c   :  { %1519 = vmatprep.subr.bf16.mxu1 %v2587_v26  ;;  %v2691_v26 = vcombine.high %v186_v20, %v190_v21  ;;  %v258_v21 = vld [vmem:[#allocation5 + $0x598] sm:$0xff] }
 0x12e   :  { %1470 = vmatmul.mubr.bf16.vlgmr.msra.gmra.mrb[8].mxu1 %v3350_v47 }
 0x12f   :  { %1520 = vmatpush1.bf16.msra.mxu1 %v2586_v29  ;;  %1551 = vmatprep.mubr.bf16.mxu1 %v3343_v42  ;;  %v2627_v42 = vcombine.high %v122_v44, %v126_v45  ;;  %v276_v29 = vrot.slane %v3364_v24, %v275_v22 }
 0x130   :  { %1521 = vmatprep.subr.bf16.mxu1 %v2595_v30  ;;  %v280_v30 = vrot.slane %v3364_v24, %v279_v25 }
 0x133   :  { %1522 = vmatpush1.bf16.msra.mxu1 %v2594_v33 }
 0x134   :  { %1523 = vmatprep.subr.bf16.mxu1 %v2603_v34  ;;  %v202_v34 = vld [vmem:[#allocation5 + $0x3d8] sm:$0xff] }
 0x135   :  { %v2707_v44 = vcombine.high %v202_v34, %v206_v35 }
 0x137   :  { %1524 = vmatpush1.bf16.msra.mxu1 %v2602_v37 }
 0x138   :  { %1525 = vmatprep.subr.bf16.mxu1 %v2611_v38 }
 0x13b   :  { %1526 = vmatpush1.bf16.msra.mxu1 %v2610_v41 }
 0x13c   :  { %1527 = vmatprep.subr.bf16.mxu1 %v2619_v43 }
 0x13f   :  { %1528 = vmatpush1.bf16.msra.mxu1 %v2618_v46  ;;  %v210_v46 = vld [vmem:[#allocation5 + $0x418] sm:$0xff] }
 0x140   :  { %1529 = vmatprep.subr.bf16.mxu1 %v2627_v42  ;;  %v214_v42 = vld [vmem:[#allocation5 + $0x438] sm:$0xff] }
 0x141   :  { %v2715_v52 = vcombine.high %v210_v46, %v214_v42 }
 0x143   :  { %1530 = vmatpush1.bf16.msra.mxu1 %v2626_v50  ;;  %v2706_v50 = vcombine.low %v202_v34, %v206_v35 }
 0x144   :  { %1531 = vmatprep.subr.bf16.mxu1 %v2635_v51 }
 0x147   :  { %1532 = vmatpush1.bf16.msra.mxu1 %v2634_v54  ;;  %v218_v54 = vld [vmem:[#allocation5 + $0x458] sm:$0xff] }
 0x148   :  { %1533 = vmatprep.subr.bf16.mxu1 %v2643_v55  ;;  %v222_v55 = vld [vmem:[#allocation5 + $0x478] sm:$0xff] }
 0x149   :  { %v1348_v59 = vpop.f32.mrb[0].mxu0 }
 0x14a   :  { %v1350_v61 = vpop.f32.mrb[1].mxu0 }
 0x14b   :  { %v1352_v1 = vpop.f32.mrb[2].mxu0  ;;  %1534 = vmatpush1.bf16.msra.mxu1 %v2642_v58  ;;  %v2714_v58 = vcombine.low %v210_v46, %v214_v42  ;;  %v3019_v46 = vld [vmem:[#allocation8 + $0x190] ss:$8 sps:$4 sm:$0xff]   ;;  %v3024_v42 = vld [vmem:[#allocation8 + $0x1a4] ss:$8 sps:$4 sm:$0xff]  }
 0x14c   :  { %v1353_v2 = vpop.f32.mrb[3].mxu0  ;;  %1535 = vmatprep.subr.bf16.mxu1 %v2651_v60  ;;  %v226_v60 = vld [vmem:[#allocation5 + $0x498] sm:$0xff]  ;;  %v2722_v1 = vcombine.low %v218_v54, %v222_v55 }
 0x14f   :  { %1536 = vmatpush1.bf16.msra.mxu1 %v2650_v3  ;;  %v234_v3 = vld [vmem:[#allocation5 + $0x4d8] sm:$0xff] }
 0x150   :  { %1537 = vmatprep.subr.bf16.mxu1 %v2659_v4  ;;  %v238_v4 = vld [vmem:[#allocation5 + $0x4f8] sm:$0xff] }
 0x153   :  { %1538 = vmatpush1.bf16.msra.mxu1 %v2658_v7 }
 0x154   :  { %1539 = vmatprep.subr.bf16.mxu1 %v2667_v8  ;;  %v2739_v8 = vcombine.high %v234_v3, %v238_v4 }
 0x157   :  { %1540 = vmatpush1.bf16.msra.mxu1 %v2666_v12 }
 0x158   :  { %1541 = vmatprep.subr.bf16.mxu1 %v2675_v13  ;;  %v250_v13 = vld [vmem:[#allocation5 + $0x558] sm:$0xff] }
 0x159   :  { %v2755_v20 = vcombine.high %v250_v13, %v254_v14  ;;  %v2754_v28 = vcombine.low %v250_v13, %v254_v14  ;;  %v3051_v13 = vld [vmem:[#allocation8 + $0x234] ss:$8 sps:$4 sm:$0xff]   ;;  %v3049_v14 = vld [vmem:[#allocation8 + $0x230] ss:$8 sps:$4 sm:$0xff]  }
 0x15b   :  { %1542 = vmatpush1.bf16.msra.mxu1 %v2674_v17  ;;  %v3009_v17 = vld [vmem:[#allocation8 + $0x154] ss:$8 sps:$4 sm:$0xff]  }
 0x15c   :  { %1543 = vmatprep.subr.bf16.mxu1 %v2683_v19 }
 0x15f   :  { %1544 = vmatpush1.bf16.msra.mxu1 %v2682_v23  ;;  %v262_v23 = vld [vmem:[#allocation5 + $0x5b8] sm:$0xff] }
 0x160   :  { %1545 = vmatprep.subr.bf16.mxu1 %v2691_v26  ;;  %v3007_v26 = vld [vmem:[#allocation8 + $0x150] ss:$8 sps:$4 sm:$0xff]   ;;  %v2762_v34 = vcombine.low %v258_v21, %v262_v23 }
 0x161   :  { %v1307_v33 = vpop.f32.mrb[0].mxu1 }
 0x162   :  { %v1308_v36 = vadd.f32 %v1307_v33, %v276_v29  ;;  %v1309_v37 = vpop.f32.mrb[1].mxu1  ;;  %v2763_v29 = vcombine.high %v258_v21, %v262_v23  ;;  %v3015_v33 = vld [vmem:[#allocation8 + $0x174] ss:$8 sps:$4 sm:$0xff]   ;;  %v3060_v21 = vld [vmem:[#allocation8 + $0x264] ss:$8 sps:$4 sm:$0xff]  }
 0x163   :  { %v1310_v38 = vadd.f32 %v1309_v37, %v280_v30  ;;  %v1311_v39 = vpop.f32.mrb[2].mxu1  ;;  %1546 = vmatpush1.bf16.msra.mxu1 %v2690_v31  ;;  %v266_v30 = vld [vmem:[#allocation5 + $0x5d8] sm:$0xff]  ;;  %v3058_v23 = vld [vmem:[#allocation8 + $0x260] ss:$8 sps:$4 sm:$0xff]  }
 0x164   :  { %v1349_v41 = vadd.f32 %v1348_v59, %v1308_v36  ;;  %v1312_v43 = vpop.f32.mrb[3].mxu1  ;;  %1547 = vmatprep.subr.bf16.mxu1 %v2699_v32  ;;  %v2723_v59 = vcombine.high %v218_v54, %v222_v55  ;;  %v270_v31 = vld [vmem:[#allocation5 + $0x5f8] sm:$0xff]  ;;  %v3010_v32 = vld [vmem:[#allocation8 + $0x160] ss:$8 sps:$4 sm:$0xff]   ;;  %v3036_v55 = vld [vmem:[#allocation8 + $0x1e4] ss:$8 sps:$4 sm:$0xff]  }
 0x165   :  { %v1351_v45 = vadd.f32 %v1350_v61, %v1310_v38  ;;  %v230_v61 = vld [vmem:[#allocation5 + $0x4b8] sm:$0xff]  ;;  %v2771_v36 = vcombine.high %v266_v30, %v270_v31  ;;  %v2770_v43 = vcombine.low %v266_v30, %v270_v31 }
 0x166   :  { %v1601_v48 = vmax.f32 %v1349_v41, 0.0  ;;  %v2731_v2 = vcombine.high %v226_v60, %v230_v61  ;;  %v2730_v7 = vcombine.low %v226_v60, %v230_v61  ;;  %v3013_v38 = vld [vmem:[#allocation8 + $0x170] ss:$8 sps:$4 sm:$0xff]   ;;  %v287_v60 = vsub.s32 3, %v3361_v16  ;;  %v3069_v30 = vld [vmem:[#allocation8 + $0x294] ss:$8 sps:$4 sm:$0xff]  }
 0x167   :  { %v1602_v49 = vmax.f32 %v1351_v45, 0.0  ;;  %1548 = vmatpush1.bf16.msra.mxu1 %v2698_v40  ;;  %v3018_v40 = vld [vmem:[#allocation8 + $0x184] ss:$8 sps:$4 sm:$0xff]   ;;  %v3021_v45 = vld [vmem:[#allocation8 + $0x194] ss:$8 sps:$4 sm:$0xff]  }
 0x168   :  { %v1609_v51 = vpack.c.bf16 %v1601_v48, %v1601_v48  ;;  %1549 = vmatprep.subr.bf16.mxu1 %v2707_v44  ;;  %v3016_v44 = vld [vmem:[#allocation8 + $0x180] ss:$8 sps:$4 sm:$0xff]   ;;  %v3031_v54 = vld [vmem:[#allocation8 + $0x1d0] ss:$8 sps:$4 sm:$0xff]  }
 0x169   :  { %v1610_v53 = vpack.c.bf16 %v1602_v49, %v1602_v49  ;;  %v3022_v48 = vld [vmem:[#allocation8 + $0x1a0] ss:$8 sps:$4 sm:$0xff]   ;;  %v3027_v49 = vld [vmem:[#allocation8 + $0x1b4] ss:$8 sps:$4 sm:$0xff]   ;;  %v3067_v31 = vld [vmem:[#allocation8 + $0x290] ss:$8 sps:$4 sm:$0xff]  }
 0x16a   :  { %v3375_v35 = vpop.f32.mrb[4].mxu0 }
 0x16b   :  { %1550 = vmatpush1.bf16.msra.mxu1 %v2706_v50  ;;  %2429 = vmatprep.mubr.bf16.mxu0 %v1610_v53  ;;  %v3377_v37 = vpop.f32.mrb[5].mxu0  ;;  %v3025_v50 = vld [vmem:[#allocation8 + $0x1b0] ss:$8 sps:$4 sm:$0xff]   ;;  %v3033_v53 = vld [vmem:[#allocation8 + $0x1d4] ss:$8 sps:$4 sm:$0xff]  }
 0x16c   :  { %2430 = vmatmul.mubr.bf16.vlgmr.msra.gmra.mrb[8].mxu0 %v1609_v51  ;;  %1560 = vmatprep.subr.bf16.mxu1 %v2715_v52  ;;  %v1516_v39 = vpop.f32.mrb[6].mxu0  ;;  %v3030_v51 = vld [vmem:[#allocation8 + $0x1c4] ss:$8 sps:$4 sm:$0xff]   ;;  %v3028_v52 = vld [vmem:[#allocation8 + $0x1c0] ss:$8 sps:$4 sm:$0xff]  }
 0x16d   :  { %2439 = vmatpush1.bf16.msra.mxu0 %v2992_v56  ;;  %v1517_v41 = vpop.f32.mrb[7].mxu0  ;;  %v3039_v56 = vld [vmem:[#allocation8 + $0x1f4] ss:$8 sps:$4 sm:$0xff]   ;;  %v3076_v39 = vld [vmem:[#allocation8 + $0x2c0] ss:$8 sps:$4 sm:$0xff]  }
 0x16e   :  { %1552 = vmatmul.mubr.bf16.vlgmr.msra.gmra.mrb[12].mxu1 %v3350_v47  ;;  %2440 = vmatprep.subr.bf16.mxu0 %v2997_v57  ;;  %v246_v47 = vld [vmem:[#allocation5 + $0x538] sm:$0xff]  ;;  %v291_v41 = vsub.s32 4, %v3361_v16 }
 0x16f   :  { %1561 = vmatpush1.bf16.msra.mxu1 %v2714_v58  ;;  %1592 = vmatprep.mubr.bf16.mxu1 %v3262_v0  ;;  %v2738_v0 = vcombine.low %v234_v3, %v238_v4  ;;  %v2747_v12 = vcombine.high %v242_v9, %v246_v47  ;;  %v2746_v19 = vcombine.low %v242_v9, %v246_v47  ;;  %v3037_v57 = vld [vmem:[#allocation8 + $0x1f0] ss:$8 sps:$4 sm:$0xff]   ;;  %v3042_v58 = vld [vmem:[#allocation8 + $0x204] ss:$8 sps:$4 sm:$0xff]   ;;  %v3040_v9 = vld [vmem:[#allocation8 + $0x200] ss:$8 sps:$4 sm:$0xff]  }
 0x170   :  { %1562 = vmatprep.subr.bf16.mxu1 %v2723_v59  ;;  %v283_v59 = vsub.s32 2, %v3361_v16 }
 0x171   :  { %2441 = vmatpush1.bf16.msra.mxu0 %v2995_v62  ;;  %v288_v62 = vrot.slane %v3364_v24, %v287_v60 }
 0x172   :  { %2442 = vmatprep.subr.bf16.mxu0 %v3000_v63  ;;  %v284_v61 = vrot.slane %v3364_v24, %v283_v59 }
 0x173   :  { %1563 = vmatpush1.bf16.msra.mxu1 %v2722_v1 }
 0x174   :  { %1564 = vmatprep.subr.bf16.mxu1 %v2731_v2 }
 0x175   :  { %2443 = vmatpush1.bf16.msra.mxu0 %v2998_v5 }
 0x176   :  { %2444 = vmatprep.subr.bf16.mxu0 %v3003_v6 }
 0x177   :  { %1565 = vmatpush1.bf16.msra.mxu1 %v2730_v7 }
 0x178   :  { %1566 = vmatprep.subr.bf16.mxu1 %v2739_v8 }
 0x179   :  { %2445 = vmatpush1.bf16.msra.mxu0 %v3001_v10  ;;  %v3045_v10 = vld [vmem:[#allocation8 + $0x214] ss:$8 sps:$4 sm:$0xff]  }
 0x17a   :  { %2446 = vmatprep.subr.bf16.mxu0 %v3006_v11  ;;  %v3043_v11 = vld [vmem:[#allocation8 + $0x210] ss:$8 sps:$4 sm:$0xff]  }
 0x17b   :  { %1567 = vmatpush1.bf16.msra.mxu1 %v2738_v0  ;;  %v3048_v0 = vld [vmem:[#allocation8 + $0x224] ss:$8 sps:$4 sm:$0xff]  }
 0x17c   :  { %1568 = vmatprep.subr.bf16.mxu1 %v2747_v12  ;;  %v3046_v12 = vld [vmem:[#allocation8 + $0x220] ss:$8 sps:$4 sm:$0xff]  }
 0x17d   :  { %2447 = vmatpush1.bf16.msra.mxu0 %v3004_v15  ;;  %v3054_v15 = vld [vmem:[#allocation8 + $0x244] ss:$8 sps:$4 sm:$0xff]  }
 0x17e   :  { %2448 = vmatprep.subr.bf16.mxu0 %v3009_v17  ;;  %v3052_v17 = vld [vmem:[#allocation8 + $0x240] ss:$8 sps:$4 sm:$0xff]  }
 0x17f   :  { %1569 = vmatpush1.bf16.msra.mxu1 %v2746_v19  ;;  %v3057_v19 = vld [vmem:[#allocation8 + $0x254] ss:$8 sps:$4 sm:$0xff]  }
 0x180   :  { %1570 = vmatprep.subr.bf16.mxu1 %v2755_v20  ;;  %v3055_v20 = vld [vmem:[#allocation8 + $0x250] ss:$8 sps:$4 sm:$0xff]  }
 0x181   :  { %2449 = vmatpush1.bf16.msra.mxu0 %v3007_v26  ;;  %v3063_v26 = vld [vmem:[#allocation8 + $0x274] ss:$8 sps:$4 sm:$0xff]  }
 0x182   :  { %2450 = vmatprep.subr.bf16.mxu0 %v3012_v27  ;;  %v3061_v27 = vld [vmem:[#allocation8 + $0x270] ss:$8 sps:$4 sm:$0xff]  }
 0x183   :  { %1571 = vmatpush1.bf16.msra.mxu1 %v2754_v28  ;;  %v3066_v28 = vld [vmem:[#allocation8 + $0x284] ss:$8 sps:$4 sm:$0xff]  }
 0x184   :  { %1572 = vmatprep.subr.bf16.mxu1 %v2763_v29  ;;  %v3064_v29 = vld [vmem:[#allocation8 + $0x280] ss:$8 sps:$4 sm:$0xff]  }
 0x185   :  { %2451 = vmatpush1.bf16.msra.mxu0 %v3010_v32  ;;  %v3072_v32 = vld [vmem:[#allocation8 + $0x2a4] ss:$8 sps:$4 sm:$0xff]  }
 0x186   :  { %2452 = vmatprep.subr.bf16.mxu0 %v3015_v33  ;;  %v3070_v33 = vld [vmem:[#allocation8 + $0x2a0] ss:$8 sps:$4 sm:$0xff]  }
 0x187   :  { %1573 = vmatpush1.bf16.msra.mxu1 %v2762_v34  ;;  %v3075_v34 = vld [vmem:[#allocation8 + $0x2b4] ss:$8 sps:$4 sm:$0xff]  }
 0x188   :  { %1574 = vmatprep.subr.bf16.mxu1 %v2771_v36  ;;  %v3073_v36 = vld [vmem:[#allocation8 + $0x2b0] ss:$8 sps:$4 sm:$0xff]  }
 0x189   :  { %2453 = vmatpush1.bf16.msra.mxu0 %v3013_v38  ;;  %v3078_v38 = vld [vmem:[#allocation8 + $0x2c4] ss:$8 sps:$4 sm:$0xff]  }
 0x18a   :  { %2454 = vmatprep.subr.bf16.mxu0 %v3018_v40  ;;  %v3081_v40 = vld [vmem:[#allocation8 + $0x2d4] ss:$8 sps:$4 sm:$0xff]  }
 0x18b   :  { %1575 = vmatpush1.bf16.msra.mxu1 %v2770_v43  ;;  %v3079_v43 = vld [vmem:[#allocation8 + $0x2d0] ss:$8 sps:$4 sm:$0xff]  }
 0x18d   :  { %2455 = vmatpush1.bf16.msra.mxu0 %v3016_v44  ;;  %v295_v44 = vsub.s32 5, %v3361_v16 }
 0x18e   :  { %1593 = vmatmul.mubr.bf16.vlgmr.msra.gmra.mrb[12].mxu1 %v3346_v18  ;;  %2456 = vmatprep.subr.bf16.mxu0 %v3021_v45  ;;  %v3034_v18 = vld [vmem:[#allocation8 + $0x1e0] ss:$8 sps:$4 sm:$0xff]   ;;  %v3084_v45 = vld [vmem:[#allocation8 + $0x2e4] ss:$8 sps:$4 sm:$0xff]  }
 0x191   :  { %2457 = vmatpush1.bf16.msra.mxu0 %v3019_v46  ;;  %v292_v46 = vrot.slane %v3364_v24, %v291_v41 }
 0x192   :  { %2458 = vmatprep.subr.bf16.mxu0 %v3024_v42  ;;  %v296_v42 = vrot.slane %v3364_v24, %v295_v44 }
 0x195   :  { %2459 = vmatpush1.bf16.msra.mxu0 %v3022_v48  ;;  %v3082_v48 = vld [vmem:[#allocation8 + $0x2e0] ss:$8 sps:$4 sm:$0xff]  }
 0x196   :  { %2460 = vmatprep.subr.bf16.mxu0 %v3027_v49  ;;  %v3087_v49 = vld [vmem:[#allocation8 + $0x2f4] ss:$8 sps:$4 sm:$0xff]  }
 0x199   :  { %2461 = vmatpush1.bf16.msra.mxu0 %v3025_v50 }
 0x19a   :  { %2462 = vmatprep.subr.bf16.mxu0 %v3030_v51 }
 0x19d   :  { %2463 = vmatpush1.bf16.msra.mxu0 %v3028_v52 }
 0x19e   :  { %2464 = vmatprep.subr.bf16.mxu0 %v3033_v53 }
 0x1a1   :  { %2465 = vmatpush1.bf16.msra.mxu0 %v3031_v54 }
 0x1a2   :  { %2466 = vmatprep.subr.bf16.mxu0 %v3036_v55  ;;  %v3085_v55 = vld [vmem:[#allocation8 + $0x2f0] ss:$8 sps:$4 sm:$0xff]  }
 0x1a5   :  { %2467 = vmatpush1.bf16.msra.mxu0 %v3034_v18 }
 0x1a6   :  { %2468 = vmatprep.subr.bf16.mxu0 %v3039_v56 }
 0x1a9   :  { %2469 = vmatpush1.bf16.msra.mxu0 %v3037_v57  ;;  %v3090_v57 = vld [vmem:[#allocation8 + $0x304] ss:$8 sps:$4 sm:$0xff]  }
 0x1aa   :  { %2479 = vmatprep.subr.bf16.mxu0 %v3042_v58 }
 0x1c1   :  { %v1430_v63 = vpop.f32.mrb[4].mxu1 }
 0x1c2   :  { %v2904_v1 = vadd.f32 %v1430_v63, %v284_v61  ;;  %v1432_v2 = vpop.f32.mrb[5].mxu1  ;;  %v3088_v63 = vld [vmem:[#allocation8 + $0x300] ss:$8 sps:$4 sm:$0xff]  }
 0x1c3   :  { %v2905_v3 = vadd.f32 %v1432_v2, %v288_v62  ;;  %v1434_v4 = vpop.f32.mrb[6].mxu1  ;;  %v3091_v2 = vld [vmem:[#allocation8 + $0x310] ss:$8 sps:$4 sm:$0xff]  }
 0x1c4   :  { %v1603_v5 = vmax.f32 %v2904_v1, 0.0  ;;  %v1435_v6 = vpop.f32.mrb[7].mxu1  ;;  %v3093_v1 = vld [vmem:[#allocation8 + $0x314] ss:$8 sps:$4 sm:$0xff]  }
 0x1c5   :  { %v1604_v7 = vmax.f32 %v2905_v3, 0.0  ;;  %v3096_v3 = vld [vmem:[#allocation8 + $0x324] ss:$8 sps:$4 sm:$0xff]   ;;  %v3099_v4 = vld [vmem:[#allocation8 + $0x334] ss:$8 sps:$4 sm:$0xff]  }
 0x1c6   :  { %v1611_v47 = vpack.c.bf16 %v1603_v5, %v1603_v5  ;;  %v3102_v5 = vld [vmem:[#allocation8 + $0x344] ss:$8 sps:$4 sm:$0xff]   ;;  %v3100_v6 = vld [vmem:[#allocation8 + $0x340] ss:$8 sps:$4 sm:$0xff]  }
 0x1c7   :  { %v1612_v8 = vpack.c.bf16 %v1604_v7, %v1604_v7  ;;  %v3105_v7 = vld [vmem:[#allocation8 + $0x354] ss:$8 sps:$4 sm:$0xff]  }
 0x1c9   :  { %2470 = vmatprep.mubr.bf16.mxu0 %v1612_v8  ;;  %v3103_v8 = vld [vmem:[#allocation8 + $0x350] ss:$8 sps:$4 sm:$0xff]  }
 0x1ca   :  { %2471 = vmatmul.mubr.bf16.vlgmr.msra.gmra.mrb[8].mxu0 %v1611_v47  ;;  %v3106_v47 = vld [vmem:[#allocation8 + $0x360] ss:$8 sps:$4 sm:$0xff]  }
 0x1cb   :  { %2480 = vmatpush1.bf16.msra.mxu0 %v3040_v9  ;;  %v3108_v9 = vld [vmem:[#allocation8 + $0x364] ss:$8 sps:$4 sm:$0xff]  }
 0x1cc   :  { %2481 = vmatprep.subr.bf16.mxu0 %v3045_v10  ;;  %v3111_v10 = vld [vmem:[#allocation8 + $0x374] ss:$8 sps:$4 sm:$0xff]  }
 0x1cf   :  { %2482 = vmatpush1.bf16.msra.mxu0 %v3043_v11  ;;  %v3109_v11 = vld [vmem:[#allocation8 + $0x370] ss:$8 sps:$4 sm:$0xff]  }
 0x1d0   :  { %2483 = vmatprep.subr.bf16.mxu0 %v3048_v0  ;;  %v3114_v0 = vld [vmem:[#allocation8 + $0x384] ss:$8 sps:$4 sm:$0xff]  }
 0x1d3   :  { %2484 = vmatpush1.bf16.msra.mxu0 %v3046_v12  ;;  %v3112_v12 = vld [vmem:[#allocation8 + $0x380] ss:$8 sps:$4 sm:$0xff]  }
 0x1d4   :  { %2485 = vmatprep.subr.bf16.mxu0 %v3051_v13  ;;  %v3117_v13 = vld [vmem:[#allocation8 + $0x394] ss:$8 sps:$4 sm:$0xff]  }
 0x1d7   :  { %2486 = vmatpush1.bf16.msra.mxu0 %v3049_v14  ;;  %v3115_v14 = vld [vmem:[#allocation8 + $0x390] ss:$8 sps:$4 sm:$0xff]  }
 0x1d8   :  { %2487 = vmatprep.subr.bf16.mxu0 %v3054_v15  ;;  %v3120_v15 = vld [vmem:[#allocation8 + $0x3a4] ss:$8 sps:$4 sm:$0xff]  }
 0x1db   :  { %2488 = vmatpush1.bf16.msra.mxu0 %v3052_v17  ;;  %v3118_v17 = vld [vmem:[#allocation8 + $0x3a0] ss:$8 sps:$4 sm:$0xff]  }
 0x1dc   :  { %2489 = vmatprep.subr.bf16.mxu0 %v3057_v19  ;;  %v3123_v19 = vld [vmem:[#allocation8 + $0x3b4] ss:$8 sps:$4 sm:$0xff]  }
 0x1df   :  { %2490 = vmatpush1.bf16.msra.mxu0 %v3055_v20  ;;  %v3121_v20 = vld [vmem:[#allocation8 + $0x3b0] ss:$8 sps:$4 sm:$0xff]  }
 0x1e0   :  { %2491 = vmatprep.subr.bf16.mxu0 %v3060_v21  ;;  %v3126_v21 = vld [vmem:[#allocation8 + $0x3c4] ss:$8 sps:$4 sm:$0xff]  }
 0x1e3   :  { %2492 = vmatpush1.bf16.msra.mxu0 %v3058_v23  ;;  %v3124_v23 = vld [vmem:[#allocation8 + $0x3c0] ss:$8 sps:$4 sm:$0xff]  }
 0x1e4   :  { %2493 = vmatprep.subr.bf16.mxu0 %v3063_v26  ;;  %v3129_v26 = vld [vmem:[#allocation8 + $0x3d4] ss:$8 sps:$4 sm:$0xff]  }
 0x1e7   :  { %2494 = vmatpush1.bf16.msra.mxu0 %v3061_v27  ;;  %v3127_v27 = vld [vmem:[#allocation8 + $0x3d0] ss:$8 sps:$4 sm:$0xff]  }
 0x1e8   :  { %2495 = vmatprep.subr.bf16.mxu0 %v3066_v28  ;;  %v3132_v28 = vld [vmem:[#allocation8 + $0x3e4] ss:$8 sps:$4 sm:$0xff]  }
 0x1eb   :  { %2496 = vmatpush1.bf16.msra.mxu0 %v3064_v29  ;;  %v3130_v29 = vld [vmem:[#allocation8 + $0x3e0] ss:$8 sps:$4 sm:$0xff]  }
 0x1ec   :  { %2497 = vmatprep.subr.bf16.mxu0 %v3069_v30  ;;  %v3135_v30 = vld [vmem:[#allocation8 + $0x3f4] ss:$8 sps:$4 sm:$0xff]  }
 0x1ef   :  { %2498 = vmatpush1.bf16.msra.mxu0 %v3067_v31  ;;  %v3133_v31 = vld [vmem:[#allocation8 + $0x3f0] ss:$8 sps:$4 sm:$0xff]  }
 0x1f0   :  { %2499 = vmatprep.subr.bf16.mxu0 %v3072_v32  ;;  %v299_v32 = vsub.s32 6, %v3361_v16 }
 0x1f3   :  { %2500 = vmatpush1.bf16.msra.mxu0 %v3070_v33  ;;  %v303_v33 = vsub.s32 7, %v3361_v16 }
 0x1f4   :  { %2501 = vmatprep.subr.bf16.mxu0 %v3075_v34  ;;  %v300_v34 = vrot.slane %v3364_v24, %v299_v32 }
 0x1f7   :  { %2502 = vmatpush1.bf16.msra.mxu0 %v3073_v36  ;;  %v304_v36 = vrot.slane %v3364_v24, %v303_v33 }
 0x1f8   :  { %2503 = vmatprep.subr.bf16.mxu0 %v3078_v38 }
 0x1fb   :  { %2504 = vmatpush1.bf16.msra.mxu0 %v3076_v39 }
 0x1fc   :  { %2505 = vmatprep.subr.bf16.mxu0 %v3081_v40 }
 0x1ff   :  { %2506 = vmatpush1.bf16.msra.mxu0 %v3079_v43 }
 0x200   :  { %2507 = vmatprep.subr.bf16.mxu0 %v3084_v45 }
 0x201   :  { %v1471_v50 = vpop.f32.mrb[8].mxu1 }
 0x202   :  { %v1472_v51 = vadd.f32 %v1471_v50, %v292_v46  ;;  %v1473_v52 = vpop.f32.mrb[9].mxu1 }
 0x203   :  { %v1474_v53 = vadd.f32 %v1473_v52, %v296_v42  ;;  %v1475_v54 = vpop.f32.mrb[10].mxu1  ;;  %2508 = vmatpush1.bf16.msra.mxu0 %v3082_v48 }
 0x204   :  { %v1513_v18 = vadd.f32 %v3375_v35, %v1472_v51  ;;  %v1476_v56 = vpop.f32.mrb[11].mxu1  ;;  %2509 = vmatprep.subr.bf16.mxu0 %v3087_v49  ;;  %v3094_v35 = vld [vmem:[#allocation8 + $0x320] ss:$8 sps:$4 sm:$0xff]  }
 0x205   :  { %v1515_v58 = vadd.f32 %v3377_v37, %v1474_v53  ;;  %v3097_v37 = vld [vmem:[#allocation8 + $0x330] ss:$8 sps:$4 sm:$0xff]   ;;  %v1745_v49 = vld [vmem:[%s3417_s4] sm:$0x3] }
 0x206   :  { %v1605_v59 = vmax.f32 %v1513_v18, 0.0  ;;  %v1750_v50 = vrot.slane %v1745_v49, %v275_v22  ;;  %v1754_v24 = vrot.slane %v1745_v49, %v279_v25 }
 0x207   :  { %v1606_v60 = vmax.f32 %v1515_v58, 0.0  ;;  %2510 = vmatpush1.bf16.msra.mxu0 %v3085_v55 }
 0x208   :  { %v1613_v61 = vpack.c.bf16 %v1605_v59, %v1605_v59  ;;  %2520 = vmatprep.subr.bf16.mxu0 %v3090_v57 }
 0x209   :  { %v1614_v62 = vpack.c.bf16 %v1606_v60, %v1606_v60 }
 0x20b   :  { %2511 = vmatprep.mubr.bf16.mxu0 %v1614_v62 }
 0x20c   :  { %2512 = vmatmul.mubr.bf16.vlgmr.msra.gmra.mrb[8].mxu0 %v1613_v61 }
 0x20d   :  { %2521 = vmatpush1.bf16.msra.mxu0 %v3088_v63 }
 0x20e   :  { %2522 = vmatprep.subr.bf16.mxu0 %v3093_v1 }
 0x211   :  { %2523 = vmatpush1.bf16.msra.mxu0 %v3091_v2 }
 0x212   :  { %2524 = vmatprep.subr.bf16.mxu0 %v3096_v3 }
 0x215   :  { %2525 = vmatpush1.bf16.msra.mxu0 %v3094_v35 }
 0x216   :  { %2526 = vmatprep.subr.bf16.mxu0 %v3099_v4 }
 0x219   :  { %2527 = vmatpush1.bf16.msra.mxu0 %v3097_v37 }
 0x21a   :  { %2528 = vmatprep.subr.bf16.mxu0 %v3102_v5 }
 0x21d   :  { %2529 = vmatpush1.bf16.msra.mxu0 %v3100_v6 }
 0x21e   :  { %2530 = vmatprep.subr.bf16.mxu0 %v3105_v7 }
 0x221   :  { %2531 = vmatpush1.bf16.msra.mxu0 %v3103_v8 }
 0x222   :  { %2532 = vmatprep.subr.bf16.mxu0 %v3108_v9 }
 0x225   :  { %2533 = vmatpush1.bf16.msra.mxu0 %v3106_v47 }
 0x226   :  { %2534 = vmatprep.subr.bf16.mxu0 %v3111_v10 }
 0x229   :  { %2535 = vmatpush1.bf16.msra.mxu0 %v3109_v11 }
 0x22a   :  { %2536 = vmatprep.subr.bf16.mxu0 %v3114_v0 }
 0x22d   :  { %2537 = vmatpush1.bf16.msra.mxu0 %v3112_v12 }
 0x22e   :  { %2538 = vmatprep.subr.bf16.mxu0 %v3117_v13 }
 0x231   :  { %2539 = vmatpush1.bf16.msra.mxu0 %v3115_v14 }
 0x232   :  { %2540 = vmatprep.subr.bf16.mxu0 %v3120_v15 }
 0x235   :  { %2541 = vmatpush1.bf16.msra.mxu0 %v3118_v17 }
 0x236   :  { %2542 = vmatprep.subr.bf16.mxu0 %v3123_v19 }
 0x239   :  { %2543 = vmatpush1.bf16.msra.mxu0 %v3121_v20 }
 0x23a   :  { %2544 = vmatprep.subr.bf16.mxu0 %v3126_v21 }
 0x23d   :  { %2545 = vmatpush1.bf16.msra.mxu0 %v3124_v23 }
 0x23e   :  { %2546 = vmatprep.subr.bf16.mxu0 %v3129_v26 }
 0x241   :  { %2547 = vmatpush1.bf16.msra.mxu0 %v3127_v27 }
 0x242   :  { %2548 = vmatprep.subr.bf16.mxu0 %v3132_v28 }
 0x245   :  { %2549 = vmatpush1.bf16.msra.mxu0 %v3130_v29 }
 0x246   :  { %2550 = vmatprep.subr.bf16.mxu0 %v3135_v30 }
 0x249   :  { %2551 = vmatpush1.bf16.msra.mxu0 %v3133_v31 }
 0x261   :  { %v1594_v38 = vpop.f32.mrb[12].mxu1 }
 0x262   :  { %v2910_v39 = vadd.f32 %v1594_v38, %v300_v34  ;;  %v1596_v40 = vpop.f32.mrb[13].mxu1 }
 0x263   :  { %v2911_v41 = vadd.f32 %v1596_v40, %v304_v36  ;;  %v1598_v43 = vpop.f32.mrb[14].mxu1 }
 0x264   :  { %v1607_v44 = vmax.f32 %v2910_v39, 0.0  ;;  %v1599_v45 = vpop.f32.mrb[15].mxu1 }
 0x265   :  { %v1608_v46 = vmax.f32 %v2911_v41, 0.0 }
 0x266   :  { %v1615_v48 = vpack.c.bf16 %v1607_v44, %v1607_v44 }
 0x267   :  { %v1616_v42 = vpack.c.bf16 %v1608_v46, %v1608_v46 }
 0x269   :  { %2552 = vmatprep.mubr.bf16.mxu0 %v1616_v42 }
 0x26a   :  { %2553 = vmatmul.mubr.bf16.vlgmr.msra.gmra.mrb[8].mxu0 %v1615_v48 }
 0x33d   :  { %v2554_v51 = vpop.f32.mrb[8].mxu0 }
 0x33e   :  { %v2912_v52 = vadd.f32 %v2554_v51, %v1750_v50  ;;  %v2556_v53 = vpop.f32.mrb[9].mxu0 }
 0x33f   :  { %v2913_v54 = vadd.f32 %v2556_v53, %v1754_v24  ;;  %v2558_v55 = vpop.f32.mrb[10].mxu0 }
 0x340   :  { %2561 = vst [vmem:[#allocation10] sm:$0xff] %v2912_v52  ;;  %v2559_v18 = vpop.f32.mrb[11].mxu0 }
 0x341   :  { %2562 = vst [vmem:[#allocation10 + $0x8] sm:$0xff] %v2913_v54 }
 0x342   :  { %3235 = shalt.err (!%p3232_p8)
}
 0x343   :  { %s3236_s21 = scalar_lea.hbm %s3418_s5, 256 }
 0x344   :  { %p3237_p9 = scmp.ne.s32.totalorder %s3418_s5, %s3236_s21  ;;  %p3240_p10 = scmp.lt.u32.totalorder %s3236_s21, %s3418_s5 }
 0x346   :  { %p3242_p11 = pnand %p3240_p10, %p3237_p9 }
 0x348   :  { %3245 = shalt.err (!%p3242_p11)
}
 0x349   :  { %2572 = dma.vmem_to_hbm [thread:$0]  %s2570_s18, 256, %s3418_s5, [#allocation4]  }
 0x34a   :  { %3252 = dma.done.wait [#allocation4], 256  }
 0x34b   :  { %3253 = vsyncadd [#allocation4], 4294967040 }
 0x34c   :  { %2576 = vsyncpa [#allocation3], 1 }
 0x34d   :  { %2577 = vsyncpa [#allocation6], 1 }
 0x34e   :  { %2578 = vsyncpa [#allocation9], 1 }
 0x34f   :  { %2579 = vsyncpa [#allocation4], 1 }

</bundles_post_ra>
